<compile_context>
chip_gen: v5e
topology: v5e:2x2
jax: 0.10.0
libtpu: 0.0.40
codegen_flags: <defaults>
</compile_context>

<pallas_src>
import numpy as np

import jax
import jax.numpy as jnp
from jax.experimental import pallas as pl
from jax.experimental.pallas import tpu as pltpu

# ----------------------- scaled-down hyper-parameters -----------------------
BIAS = True
DILATION = 2
HIDDEN = 32
KERNEL = 2
NUM_LAYERS = 3
SKIP_START = 2
BATCH_SIZE = 2
PRED_LEN = 8
SEQ_LEN = 32
_RECEPTIVE = sum(DILATION ** i * (KERNEL - 1) for i in range(NUM_LAYERS))
PRE_HIDDEN = SEQ_LEN - _RECEPTIVE            # 32 - (1+2+4) = 25
FLAT = 2 ** NUM_LAYERS * PRE_HIDDEN          # 200
BN_EPS = 1e-5                                # nn.BatchNorm1d default

SKIP_LIST = [idx >= SKIP_START for idx in range(NUM_LAYERS)]

CH = 2 ** NUM_LAYERS                 # bottleneck channel count (8)
SEG = 64                             # per-sample lane stride (pow2, >= SEQ_LEN)
LANES = BATCH_SIZE * SEG             # 128  -> full-lane-tile activations
BH = BATCH_SIZE * HIDDEN             # 64   -> lanes used by the latent z

assert KERNEL == 2, "roll-based overlap-add below is specialised for KERNEL == 2"
assert SEQ_LEN <= SEG and (SEG & (SEG - 1)) == 0
assert HIDDEN <= SEG


# ------------------------- packed-parameter layout ---------------------------
def _build_layout():
    """Static map: name -> (row_offset, rows, cols) inside the packed buffer.
    Every block starts on an 8-row (sublane-tile) boundary."""
    layout = {}
    cur = 0

    def add(name, rows, cols):
        nonlocal cur
        layout[name] = (cur, rows, cols)
        cur += -(-rows // 8) * 8

    for i in range(NUM_LAYERS):                      # encoder Conv1d layers
        cout, cin = 2 ** (i + 1), 2 ** i
        add(f"enc{i}_w0", cout, cin)
        add(f"enc{i}_w1", cout, cin)
        add(f"enc{i}_b", cout, 1)
        add(f"enc{i}_g", cout, 1)
        add(f"enc{i}_be", cout, 1)
    add("enc_hid_w", CH * LANES, BH)                 # CH blocks of (LANES, BH)
    add("enc_hid_b", 1, BH)
    add("dec_hid_w", 2 * CH * BH, LANES)             # 2*CH blocks of (BH, LANES)
    add("dec_hid_b", 2 * CH, LANES)
    for i in range(NUM_LAYERS):                      # fused R+P ConvTranspose1d
        cout, cin = 2 ** i, 2 ** (i + 1)
        add(f"dec{i}_w0", 2 * cout, 2 * cin)
        add(f"dec{i}_w1", 2 * cout, 2 * cin)
        add(f"dec{i}_b", 2 * cout, 1)
        add(f"dec{i}_g", 2 * cout, 1)
        add(f"dec{i}_be", 2 * cout, 1)
    add("fc_w", LANES, BATCH_SIZE * PRED_LEN)        # PDecoder output_fc
    add("fc_b", 1, BATCH_SIZE * PRED_LEN)
    return layout, cur


_LAYOUT, _TOTAL_ROWS = _build_layout()


# ------------------------------ fused kernel ---------------------------------
def _fwd_kernel(x_ref, s_ref, pw_ref, out_ref):
    f32 = jnp.float32

    def getp(name):                                  # lazy, static VMEM slice
        off, r, c = _LAYOUT[name]
        return pw_ref[off:off + r, 0:c]

    # lane position inside each sample's SEG-wide segment (hoisted once)
    col = jax.lax.broadcasted_iota(jnp.int32, (1, LANES), 1)
    pos = jnp.bitwise_and(col, SEG - 1)
    _masks = {}

    def vmask(n):                                    # (1, LANES) validity mask
        if n not in _masks:
            _masks[n] = (pos < n).astype(f32)
        return _masks[n]

    def bn_tanh(y, gamma, beta, n):
        """Train-mode BatchNorm1d over the (batch, valid-length) lanes + tanh."""
        m = vmask(n)
        inv = 1.0 / float(BATCH_SIZE * n)
        mu = jnp.sum(y * m, axis=1, keepdims=True) * inv
        cen = (y - mu) * m
        var = jnp.sum(cen * cen, axis=1, keepdims=True) * inv
        return jnp.tanh((y - mu) * jax.lax.rsqrt(var + BN_EPS) * gamma + beta)

    def cmat(w, v):                                  # (Co, Ci) @ (Ci, LANES)
        if w.shape[1] == 1:                          # Ci == 1 -> broadcast mul
            return w * v
        return jnp.dot(w, v, preferred_element_type=f32)

    # ------------------------------- Encoder --------------------------------
    h = jnp.tanh(x_ref[...] * s_ref[0] + s_ref[1])   # 1x1 conv + tanh, (1,LANES)
    ln = SEQ_LEN
    skips = [None] * NUM_LAYERS
    for i in range(NUM_LAYERS):
        dil = DILATION ** i
        shifted = pltpu.roll(h, LANES - dil, axis=1)            # h[:, t + dil]
        raw = (cmat(getp(f"enc{i}_w0"), h)
               + cmat(getp(f"enc{i}_w1"), shifted)
               + getp(f"enc{i}_b"))
        ln -= dil * (KERNEL - 1)
        if SKIP_LIST[i]:
            skips[i] = raw                                      # pre-BN clone()
        h = bn_tanh(raw, getp(f"enc{i}_g"), getp(f"enc{i}_be"), ln)

    # flatten(start_dim=1) + Linear(FLAT->HIDDEN) + tanh, via per-channel
    # host-prepacked (LANES, BH) weights (flatten + batch block-diag baked in).
    ehw_off, _, _ = _LAYOUT["enc_hid_w"]
    z = getp("enc_hid_b")                                       # (1, BH)
    for ch in range(CH):
        wc = pw_ref[ehw_off + ch * LANES: ehw_off + (ch + 1) * LANES, 0:BH]
        z = z + jnp.dot(h[ch:ch + 1, :], wc, preferred_element_type=f32)
    z = jnp.tanh(z)                                             # z[0, b*HIDDEN+j]

    # -------------------------- Fused R+P decoders --------------------------
    # rows [0, C) of every stacked tensor = RDecoder, rows [C, 2C) = PDecoder;
    # deconv weights / biases / BN params are block-diagonal / stacked.
    dhw_off, _, _ = _LAYOUT["dec_hid_w"]
    rows = []
    for cc in range(2 * CH):
        wd = pw_ref[dhw_off + cc * BH: dhw_off + (cc + 1) * BH, 0:LANES]
        rows.append(jnp.dot(z, wd, preferred_element_type=f32))
    hd = jnp.tanh(jnp.concatenate(rows, axis=0) + getp("dec_hid_b"))  # (2C,LANES)

    ln = PRE_HIDDEN
    for i in reversed(range(NUM_LAYERS)):
        dil = DILATION ** i
        if SKIP_LIST[i]:                             # encoder skip, both halves
            hd = hd + jnp.concatenate([skips[i], skips[i]], axis=0)
        xm = hd * vmask(ln)                          # zero invalid lanes
        p0 = cmat(getp(f"dec{i}_w0"), xm)
        p1 = cmat(getp(f"dec{i}_w1"), xm)
        hd = p0 + pltpu.roll(p1, dil, axis=1) + getp(f"dec{i}_b")  # overlap-add
        ln += dil * (KERNEL - 1)
        if i != 0:                                   # PDecoder skips BN@layer 0
            hd = bn_tanh(hd, getp(f"dec{i}_g"), getp(f"dec{i}_be"), ln)

    # hd: (2, LANES); row 0 = R (still needs its layer-0 BN+tanh), row 1 = P raw
    g0 = getp("dec0_g")
    b0 = getp("dec0_be")
    hr = bn_tanh(hd[0:1, :], g0[0:1, :], b0[0:1, :], SEQ_LEN)
    y_r = hr * s_ref[2] + s_ref[3]                   # RDecoder 1x1 conv (no tanh)

    hp = jnp.tanh(hd[1:2, :] * s_ref[4] + s_ref[5])  # PDecoder 1x1 conv + tanh
    y_p = (jnp.dot(hp, getp("fc_w"), preferred_element_type=f32)
           + getp("fc_b"))                           # Linear(SEQ_LEN->PRED_LEN)

    pad = jnp.zeros((1, LANES - BATCH_SIZE * PRED_LEN), f32)
    out_ref[...] = jnp.concatenate(
        [y_r, jnp.concatenate([y_p, pad], axis=1)], axis=0)     # (2, LANES)


# --------------------------- parameter creation ------------------------------
def _xavier(key, shape, fan_in, fan_out):
    lim = float(np.sqrt(6.0 / (fan_in + fan_out)))
    return jax.random.uniform(key, shape, jnp.float32, -lim, lim)


def init_params(key):
    """Logical parameters in torch-native layouts (Conv1d (Co,Ci,K),
    ConvTranspose1d (Ci,Co,K), Linear weights stored as (in, out))."""
    ks = iter(jax.random.split(key, 32))
    p = {}
    p["enc_in_w"] = _xavier(next(ks), (), 1, 1)
    p["enc_in_b"] = jnp.zeros((), jnp.float32)
    enc = []
    for i in range(NUM_LAYERS):
        cin, cout = 2 ** i, 2 ** (i + 1)
        enc.append(dict(
            w=_xavier(next(ks), (cout, cin, KERNEL), cin * KERNEL, cout * KERNEL),
            b=jax.random.uniform(next(ks), (cout,), jnp.float32, -0.1, 0.1),
            gamma=jnp.ones((cout,), jnp.float32),
            beta=jnp.zeros((cout,), jnp.float32)))
    p["enc_layers"] = enc
    p["enc_hid_w"] = _xavier(next(ks), (FLAT, HIDDEN), FLAT, HIDDEN)
    p["enc_hid_b"] = jnp.zeros((HIDDEN,), jnp.float32)
    for name in ("r", "p"):
        p[f"{name}_hid_w"] = _xavier(next(ks), (HIDDEN, FLAT), HIDDEN, FLAT)
        p[f"{name}_hid_b"] = jnp.zeros((FLAT,), jnp.float32)
        layers = []
        for i in range(NUM_LAYERS):
            cin, cout = 2 ** (i + 1), 2 ** i
            layers.append(dict(
                w=_xavier(next(ks), (cin, cout, KERNEL),
                          cin * KERNEL, cout * KERNEL),
                b=jax.random.uniform(next(ks), (cout,), jnp.float32, -0.1, 0.1),
                gamma=jnp.ones((cout,), jnp.float32),
                beta=jnp.zeros((cout,), jnp.float32)))
        p[f"{name}_layers"] = layers
        p[f"{name}_out_w"] = _xavier(next(ks), (), 1, 1)
        p[f"{name}_out_b"] = jnp.zeros((), jnp.float32)
    p["p_fc_w"] = _xavier(next(ks), (SEQ_LEN, PRED_LEN), SEQ_LEN, PRED_LEN)
    p["p_fc_b"] = jnp.zeros((PRED_LEN,), jnp.float32)
    return p


def pack_params(params):
    """Host-side one-time packing into the kernel's single VMEM buffer + the
    SMEM scalar vector (done once, outside jit)."""
    pw = np.zeros((_TOTAL_ROWS, LANES), np.float32)

    def put(name, arr):
        off, r, c = _LAYOUT[name]
        pw[off:off + r, :c] = np.asarray(arr, np.float32).reshape(r, c)

    # encoder Conv1d layers: tap-split weights, bias / BN columns
    for i in range(NUM_LAYERS):
        lp = params["enc_layers"][i]
        w = np.asarray(lp["w"], np.float32)                       # (Co, Ci, K)
        put(f"enc{i}_w0", w[:, :, 0])
        put(f"enc{i}_w1", w[:, :, 1])
        put(f"enc{i}_b", np.asarray(lp["b"]).reshape(-1, 1))
        put(f"enc{i}_g", np.asarray(lp["gamma"]).reshape(-1, 1))
        put(f"enc{i}_be", np.asarray(lp["beta"]).reshape(-1, 1))

    # encoder hidden Linear: per-channel (LANES, BH) blocks, flatten + batch
    # block-diagonality (and zeroing of invalid lanes) baked in.
    whid = np.asarray(params["enc_hid_w"], np.float32)            # (FLAT, HIDDEN)
    blk = np.zeros((CH, LANES, BH), np.float32)
    for ch in range(CH):
        for b in range(BATCH_SIZE):
            blk[ch, b * SEG: b * SEG + PRE_HIDDEN,
                b * HIDDEN:(b + 1) * HIDDEN] = \
                whid[ch * PRE_HIDDEN:(ch + 1) * PRE_HIDDEN, :]
    put("enc_hid_w", blk)
    put("enc_hid_b", np.tile(np.asarray(params["enc_hid_b"], np.float32),
                             BATCH_SIZE))

    # fused decoder hidden Linears: 2*CH blocks of (BH, LANES); rows [0,CH)=R,
    # [CH,2CH)=P; unflatten-to-lane-layout baked into the packing.
    blk = np.zeros((2 * CH, BH, LANES), np.float32)
    dhb = np.zeros((2 * CH, LANES), np.float32)
    for half, nm in enumerate(("r", "p")):
        wd = np.asarray(params[f"{nm}_hid_w"], np.float32)        # (HIDDEN, FLAT)
        bd = np.asarray(params[f"{nm}_hid_b"], np.float32)        # (FLAT,)
        for ch in range(CH):
            cc = half * CH + ch
            for b in range(BATCH_SIZE):
                blk[cc, b * HIDDEN:(b + 1) * HIDDEN,
                    b * SEG: b * SEG + PRE_HIDDEN] = \
                    wd[:, ch * PRE_HIDDEN:(ch + 1) * PRE_HIDDEN]
                dhb[cc, b * SEG: b * SEG + PRE_HIDDEN] = \
                    bd[ch * PRE_HIDDEN:(ch + 1) * PRE_HIDDEN]
    put("dec_hid_w", blk)
    put("dec_hid_b", dhb)

    # fused (block-diagonal over R/P) ConvTranspose1d layers
    for i in range(NUM_LAYERS):
        cin, cout = 2 ** (i + 1), 2 ** i
        rw = np.asarray(params["r_layers"][i]["w"], np.float32)   # (Ci, Co, K)
        pwt = np.asarray(params["p_layers"][i]["w"], np.float32)
        for k in range(KERNEL):
            wf = np.zeros((2 * cout, 2 * cin), np.float32)
            wf[:cout, :cin] = rw[:, :, k].T
            wf[cout:, cin:] = pwt[:, :, k].T
            put(f"dec{i}_w{k}", wf)
        for tag, pk in (("b", "b"), ("g", "gamma"), ("be", "beta")):
            put(f"dec{i}_{tag}", np.concatenate(
                [np.asarray(params["r_layers"][i][pk], np.float32),
                 np.asarray(params["p_layers"][i][pk], np.float32)]
            ).reshape(-1, 1))

    # PDecoder output_fc: block-diagonal over batch in lane space
    fcw = np.asarray(params["p_fc_w"], np.float32)                # (SEQ, PRED)
    blk = np.zeros((LANES, BATCH_SIZE * PRED_LEN), np.float32)
    for b in range(BATCH_SIZE):
        blk[b * SEG: b * SEG + SEQ_LEN, b * PRED_LEN:(b + 1) * PRED_LEN] = fcw
    put("fc_w", blk)
    put("fc_b", np.tile(np.asarray(params["p_fc_b"], np.float32), BATCH_SIZE))

    scal = np.array([float(params["enc_in_w"]), float(params["enc_in_b"]),
                     float(params["r_out_w"]), float(params["r_out_b"]),
                     float(params["p_out_w"]), float(params["p_out_b"])],
                    np.float32)
    return jnp.asarray(scal), jnp.asarray(pw)


# ------------------------------ full forward ---------------------------------
def autoencoder_forward(scal, pw, x):
    """x: (BATCH_SIZE, 1, SEQ_LEN) torch-NCL.  Returns (y_r, y_p)."""
    x_pad = jnp.pad(x.astype(jnp.float32),
                    ((0, 0), (0, 0), (0, SEG - SEQ_LEN)))
    x_lanes = x_pad.reshape(1, LANES)                # lane = b*SEG + t

    out = pl.pallas_call(
        _fwd_kernel,
        out_shape=jax.ShapeDtypeStruct((2, LANES), jnp.float32),
        in_specs=[
            pl.BlockSpec(memory_space=pltpu.MemorySpace.VMEM),   # x
            pl.BlockSpec(memory_space=pltpu.MemorySpace.SMEM),   # scalars
            pl.BlockSpec(memory_space=pltpu.MemorySpace.VMEM),   # packed params
        ],
        out_specs=pl.BlockSpec(memory_space=pltpu.MemorySpace.VMEM),
    )(x_lanes, scal, pw)

    y_r = out[0].reshape(BATCH_SIZE, SEG)[:, :SEQ_LEN] \
             .reshape(BATCH_SIZE, 1, SEQ_LEN)
    y_p = out[1, :BATCH_SIZE * PRED_LEN].reshape(BATCH_SIZE, 1, PRED_LEN)
    return y_r, y_p


# ---------------------------------- main --------------------------------------
if __name__ == "__main__":
    key = jax.random.PRNGKey(0)
    pkey, xkey = jax.random.split(key)
    params = init_params(pkey)
    scal, pw = pack_params(params)                    # one-time host packing
    x = jax.random.normal(xkey, (BATCH_SIZE, 1, SEQ_LEN), jnp.float32)

    fwd = jax.jit(autoencoder_forward)
    y_r, y_p = fwd(scal, pw, x)
    jax.block_until_ready((y_r, y_p))

    assert y_r.shape == (BATCH_SIZE, 1, SEQ_LEN), y_r.shape
    assert y_p.shape == (BATCH_SIZE, 1, PRED_LEN), y_p.shape
    assert bool(jnp.all(jnp.isfinite(y_r))) and bool(jnp.all(jnp.isfinite(y_p)))
    print("KERNEL_OK")
</pallas_src>

<mosaic_0001>
module attributes {stable_mosaic.version = 11 : i64} {
  func.func @_fwd_kernel(%arg0: memref<1x128xf32, #tpu.memory_space<vmem>>, %arg1: memref<6xf32, #tpu.memory_space<smem>>, %arg2: memref<2448x128xf32, #tpu.memory_space<vmem>>, %arg3: memref<2x128xf32, #tpu.memory_space<vmem>>) attributes {dimension_semantics = [], scalar_prefetch = 0 : i64, scratch_operands = 0 : i64, tpu.core_type = #tpu.core_type<tc>} {
    %0 = tpu.iota {dimensions = array<i32: 1>} : vector<1x128xi32>
    %c63_i32 = arith.constant 63 : i32
    %1 = vector.broadcast %c63_i32 : i32 to vector<1x128xi32>
    %2 = arith.andi %0, %1 : vector<1x128xi32>
    %c0 = arith.constant 0 : index
    %c0_0 = arith.constant 0 : index
    %3 = vector.load %arg0[%c0, %c0_0] : memref<1x128xf32, #tpu.memory_space<vmem>>, vector<1x128xf32>
    %c0_1 = arith.constant 0 : index
    %4 = memref.load %arg1[%c0_1] : memref<6xf32, #tpu.memory_space<smem>>
    %5 = vector.broadcast %4 : f32 to vector<1x128xf32>
    %6 = arith.mulf %3, %5 : vector<1x128xf32>
    %c1 = arith.constant 1 : index
    %7 = memref.load %arg1[%c1] : memref<6xf32, #tpu.memory_space<smem>>
    %8 = vector.broadcast %7 : f32 to vector<1x128xf32>
    %9 = arith.addf %6, %8 : vector<1x128xf32>
    %10 = math.tanh %9 : vector<1x128xf32>
    %c127_i32 = arith.constant 127 : i32
    %11 = tpu.dynamic_rotate %10 by %c127_i32 dim 1 : vector<1x128xf32>, i32 -> vector<1x128xf32>
    %c0_2 = arith.constant 0 : index
    %c0_3 = arith.constant 0 : index
    %12 = vector.load %arg2[%c0_2, %c0_3] : memref<2448x128xf32, #tpu.memory_space<vmem>>, vector<2x1xf32>
    %13 = vector.broadcast %12 : vector<2x1xf32> to vector<2x128xf32>
    %14 = vector.broadcast %10 : vector<1x128xf32> to vector<2x128xf32>
    %15 = arith.mulf %13, %14 : vector<2x128xf32>
    %c8 = arith.constant 8 : index
    %c0_4 = arith.constant 0 : index
    %16 = vector.load %arg2[%c8, %c0_4] : memref<2448x128xf32, #tpu.memory_space<vmem>>, vector<2x1xf32>
    %17 = vector.broadcast %16 : vector<2x1xf32> to vector<2x128xf32>
    %18 = vector.broadcast %11 : vector<1x128xf32> to vector<2x128xf32>
    %19 = arith.mulf %17, %18 : vector<2x128xf32>
    %20 = arith.addf %15, %19 : vector<2x128xf32>
    %c16 = arith.constant 16 : index
    %c0_5 = arith.constant 0 : index
    %21 = vector.load %arg2[%c16, %c0_5] : memref<2448x128xf32, #tpu.memory_space<vmem>>, vector<2x1xf32>
    %22 = vector.broadcast %21 : vector<2x1xf32> to vector<2x128xf32>
    %23 = arith.addf %20, %22 : vector<2x128xf32>
    %c24 = arith.constant 24 : index
    %c0_6 = arith.constant 0 : index
    %24 = vector.load %arg2[%c24, %c0_6] : memref<2448x128xf32, #tpu.memory_space<vmem>>, vector<2x1xf32>
    %c32 = arith.constant 32 : index
    %c0_7 = arith.constant 0 : index
    %25 = vector.load %arg2[%c32, %c0_7] : memref<2448x128xf32, #tpu.memory_space<vmem>>, vector<2x1xf32>
    %c31_i32 = arith.constant 31 : i32
    %26 = vector.broadcast %c31_i32 : i32 to vector<1x128xi32>
    %27 = arith.cmpi slt, %2, %26 : vector<1x128xi32>
    %28 = arith.extui %27 : vector<1x128xi1> to vector<1x128xi32>
    %29 = arith.sitofp %28 : vector<1x128xi32> to vector<1x128xf32>
    %30 = vector.broadcast %29 : vector<1x128xf32> to vector<2x128xf32>
    %31 = arith.mulf %23, %30 : vector<2x128xf32>
    %cst = arith.constant dense<0.000000e+00> : vector<2xf32>
    %32 = vector.multi_reduction <add>, %31, %cst [1] : vector<2x128xf32> to vector<2xf32>
    %33 = vector.shape_cast %32 : vector<2xf32> to vector<2x1xf32>
    %cst_8 = arith.constant 0.0161290318 : f32
    %34 = vector.broadcast %cst_8 : f32 to vector<2x1xf32>
    %35 = arith.mulf %33, %34 : vector<2x1xf32>
    %36 = vector.broadcast %35 : vector<2x1xf32> to vector<2x128xf32>
    %37 = arith.subf %23, %36 : vector<2x128xf32>
    %38 = vector.broadcast %29 : vector<1x128xf32> to vector<2x128xf32>
    %39 = arith.mulf %37, %38 : vector<2x128xf32>
    %40 = arith.mulf %39, %39 : vector<2x128xf32>
    %cst_9 = arith.constant dense<0.000000e+00> : vector<2xf32>
    %41 = vector.multi_reduction <add>, %40, %cst_9 [1] : vector<2x128xf32> to vector<2xf32>
    %42 = vector.shape_cast %41 : vector<2xf32> to vector<2x1xf32>
    %cst_10 = arith.constant 0.0161290318 : f32
    %43 = vector.broadcast %cst_10 : f32 to vector<2x1xf32>
    %44 = arith.mulf %42, %43 : vector<2x1xf32>
    %45 = vector.broadcast %35 : vector<2x1xf32> to vector<2x128xf32>
    %46 = arith.subf %23, %45 : vector<2x128xf32>
    %cst_11 = arith.constant 9.99999974E-6 : f32
    %47 = vector.broadcast %cst_11 : f32 to vector<2x1xf32>
    %48 = arith.addf %44, %47 : vector<2x1xf32>
    %49 = math.rsqrt %48 : vector<2x1xf32>
    %50 = vector.broadcast %49 : vector<2x1xf32> to vector<2x128xf32>
    %51 = arith.mulf %46, %50 : vector<2x128xf32>
    %52 = vector.broadcast %24 : vector<2x1xf32> to vector<2x128xf32>
    %53 = arith.mulf %51, %52 : vector<2x128xf32>
    %54 = vector.broadcast %25 : vector<2x1xf32> to vector<2x128xf32>
    %55 = arith.addf %53, %54 : vector<2x128xf32>
    %56 = math.tanh %55 : vector<2x128xf32>
    %c126_i32 = arith.constant 126 : i32
    %57 = tpu.dynamic_rotate %56 by %c126_i32 dim 1 : vector<2x128xf32>, i32 -> vector<2x128xf32>
    %c40 = arith.constant 40 : index
    %c0_12 = arith.constant 0 : index
    %58 = vector.load %arg2[%c40, %c0_12] : memref<2448x128xf32, #tpu.memory_space<vmem>>, vector<4x2xf32>
    %cst_13 = arith.constant dense<0.000000e+00> : vector<4x128xf32>
    %59 = tpu.matmul %58, %56, %cst_13 {dimension_numbers = #tpu.dot_dimension_numbers<[1], [0], [0], [1], [0, 0, 1, 1], [], []>} : vector<4x2xf32>, vector<2x128xf32>, vector<4x128xf32> -> vector<4x128xf32>
    %c48 = arith.constant 48 : index
    %c0_14 = arith.constant 0 : index
    %60 = vector.load %arg2[%c48, %c0_14] : memref<2448x128xf32, #tpu.memory_space<vmem>>, vector<4x2xf32>
    %cst_15 = arith.constant dense<0.000000e+00> : vector<4x128xf32>
    %61 = tpu.matmul %60, %57, %cst_15 {dimension_numbers = #tpu.dot_dimension_numbers<[1], [0], [0], [1], [0, 0, 1, 1], [], []>} : vector<4x2xf32>, vector<2x128xf32>, vector<4x128xf32> -> vector<4x128xf32>
    %62 = arith.addf %59, %61 : vector<4x128xf32>
    %c56 = arith.constant 56 : index
    %c0_16 = arith.constant 0 : index
    %63 = vector.load %arg2[%c56, %c0_16] : memref<2448x128xf32, #tpu.memory_space<vmem>>, vector<4x1xf32>
    %64 = vector.broadcast %63 : vector<4x1xf32> to vector<4x128xf32>
    %65 = arith.addf %62, %64 : vector<4x128xf32>
    %c64 = arith.constant 64 : index
    %c0_17 = arith.constant 0 : index
    %66 = vector.load %arg2[%c64, %c0_17] : memref<2448x128xf32, #tpu.memory_space<vmem>>, vector<4x1xf32>
    %c72 = arith.constant 72 : index
    %c0_18 = arith.constant 0 : index
    %67 = vector.load %arg2[%c72, %c0_18] : memref<2448x128xf32, #tpu.memory_space<vmem>>, vector<4x1xf32>
    %c29_i32 = arith.constant 29 : i32
    %68 = vector.broadcast %c29_i32 : i32 to vector<1x128xi32>
    %69 = arith.cmpi slt, %2, %68 : vector<1x128xi32>
    %70 = arith.extui %69 : vector<1x128xi1> to vector<1x128xi32>
    %71 = arith.sitofp %70 : vector<1x128xi32> to vector<1x128xf32>
    %72 = vector.broadcast %71 : vector<1x128xf32> to vector<4x128xf32>
    %73 = arith.mulf %65, %72 : vector<4x128xf32>
    %cst_19 = arith.constant dense<0.000000e+00> : vector<4xf32>
    %74 = vector.multi_reduction <add>, %73, %cst_19 [1] : vector<4x128xf32> to vector<4xf32>
    %75 = vector.shape_cast %74 : vector<4xf32> to vector<4x1xf32>
    %cst_20 = arith.constant 0.0172413792 : f32
    %76 = vector.broadcast %cst_20 : f32 to vector<4x1xf32>
    %77 = arith.mulf %75, %76 : vector<4x1xf32>
    %78 = vector.broadcast %77 : vector<4x1xf32> to vector<4x128xf32>
    %79 = arith.subf %65, %78 : vector<4x128xf32>
    %80 = vector.broadcast %71 : vector<1x128xf32> to vector<4x128xf32>
    %81 = arith.mulf %79, %80 : vector<4x128xf32>
    %82 = arith.mulf %81, %81 : vector<4x128xf32>
    %cst_21 = arith.constant dense<0.000000e+00> : vector<4xf32>
    %83 = vector.multi_reduction <add>, %82, %cst_21 [1] : vector<4x128xf32> to vector<4xf32>
    %84 = vector.shape_cast %83 : vector<4xf32> to vector<4x1xf32>
    %cst_22 = arith.constant 0.0172413792 : f32
    %85 = vector.broadcast %cst_22 : f32 to vector<4x1xf32>
    %86 = arith.mulf %84, %85 : vector<4x1xf32>
    %87 = vector.broadcast %77 : vector<4x1xf32> to vector<4x128xf32>
    %88 = arith.subf %65, %87 : vector<4x128xf32>
    %cst_23 = arith.constant 9.99999974E-6 : f32
    %89 = vector.broadcast %cst_23 : f32 to vector<4x1xf32>
    %90 = arith.addf %86, %89 : vector<4x1xf32>
    %91 = math.rsqrt %90 : vector<4x1xf32>
    %92 = vector.broadcast %91 : vector<4x1xf32> to vector<4x128xf32>
    %93 = arith.mulf %88, %92 : vector<4x128xf32>
    %94 = vector.broadcast %66 : vector<4x1xf32> to vector<4x128xf32>
    %95 = arith.mulf %93, %94 : vector<4x128xf32>
    %96 = vector.broadcast %67 : vector<4x1xf32> to vector<4x128xf32>
    %97 = arith.addf %95, %96 : vector<4x128xf32>
    %98 = math.tanh %97 : vector<4x128xf32>
    %c124_i32 = arith.constant 124 : i32
    %99 = tpu.dynamic_rotate %98 by %c124_i32 dim 1 : vector<4x128xf32>, i32 -> vector<4x128xf32>
    %c80 = arith.constant 80 : index
    %c0_24 = arith.constant 0 : index
    %100 = vector.load %arg2[%c80, %c0_24] : memref<2448x128xf32, #tpu.memory_space<vmem>>, vector<8x4xf32>
    %cst_25 = arith.constant dense<0.000000e+00> : vector<8x128xf32>
    %101 = tpu.matmul %100, %98, %cst_25 {dimension_numbers = #tpu.dot_dimension_numbers<[1], [0], [0], [1], [0, 0, 1, 1], [], []>} : vector<8x4xf32>, vector<4x128xf32>, vector<8x128xf32> -> vector<8x128xf32>
    %c88 = arith.constant 88 : index
    %c0_26 = arith.constant 0 : index
    %102 = vector.load %arg2[%c88, %c0_26] : memref<2448x128xf32, #tpu.memory_space<vmem>>, vector<8x4xf32>
    %cst_27 = arith.constant dense<0.000000e+00> : vector<8x128xf32>
    %103 = tpu.matmul %102, %99, %cst_27 {dimension_numbers = #tpu.dot_dimension_numbers<[1], [0], [0], [1], [0, 0, 1, 1], [], []>} : vector<8x4xf32>, vector<4x128xf32>, vector<8x128xf32> -> vector<8x128xf32>
    %104 = arith.addf %101, %103 : vector<8x128xf32>
    %c96 = arith.constant 96 : index
    %c0_28 = arith.constant 0 : index
    %105 = vector.load %arg2[%c96, %c0_28] : memref<2448x128xf32, #tpu.memory_space<vmem>>, vector<8x1xf32>
    %106 = vector.broadcast %105 : vector<8x1xf32> to vector<8x128xf32>
    %107 = arith.addf %104, %106 : vector<8x128xf32>
    %c104 = arith.constant 104 : index
    %c0_29 = arith.constant 0 : index
    %108 = vector.load %arg2[%c104, %c0_29] : memref<2448x128xf32, #tpu.memory_space<vmem>>, vector<8x1xf32>
    %c112 = arith.constant 112 : index
    %c0_30 = arith.constant 0 : index
    %109 = vector.load %arg2[%c112, %c0_30] : memref<2448x128xf32, #tpu.memory_space<vmem>>, vector<8x1xf32>
    %c25_i32 = arith.constant 25 : i32
    %110 = vector.broadcast %c25_i32 : i32 to vector<1x128xi32>
    %111 = arith.cmpi slt, %2, %110 : vector<1x128xi32>
    %112 = arith.extui %111 : vector<1x128xi1> to vector<1x128xi32>
    %113 = arith.sitofp %112 : vector<1x128xi32> to vector<1x128xf32>
    %114 = vector.broadcast %113 : vector<1x128xf32> to vector<8x128xf32>
    %115 = arith.mulf %107, %114 : vector<8x128xf32>
    %cst_31 = arith.constant dense<0.000000e+00> : vector<8xf32>
    %116 = vector.multi_reduction <add>, %115, %cst_31 [1] : vector<8x128xf32> to vector<8xf32>
    %117 = vector.shape_cast %116 : vector<8xf32> to vector<8x1xf32>
    %cst_32 = arith.constant 2.000000e-02 : f32
    %118 = vector.broadcast %cst_32 : f32 to vector<8x1xf32>
    %119 = arith.mulf %117, %118 : vector<8x1xf32>
    %120 = vector.broadcast %119 : vector<8x1xf32> to vector<8x128xf32>
    %121 = arith.subf %107, %120 : vector<8x128xf32>
    %122 = vector.broadcast %113 : vector<1x128xf32> to vector<8x128xf32>
    %123 = arith.mulf %121, %122 : vector<8x128xf32>
    %124 = arith.mulf %123, %123 : vector<8x128xf32>
    %cst_33 = arith.constant dense<0.000000e+00> : vector<8xf32>
    %125 = vector.multi_reduction <add>, %124, %cst_33 [1] : vector<8x128xf32> to vector<8xf32>
    %126 = vector.shape_cast %125 : vector<8xf32> to vector<8x1xf32>
    %cst_34 = arith.constant 2.000000e-02 : f32
    %127 = vector.broadcast %cst_34 : f32 to vector<8x1xf32>
    %128 = arith.mulf %126, %127 : vector<8x1xf32>
    %129 = vector.broadcast %119 : vector<8x1xf32> to vector<8x128xf32>
    %130 = arith.subf %107, %129 : vector<8x128xf32>
    %cst_35 = arith.constant 9.99999974E-6 : f32
    %131 = vector.broadcast %cst_35 : f32 to vector<8x1xf32>
    %132 = arith.addf %128, %131 : vector<8x1xf32>
    %133 = math.rsqrt %132 : vector<8x1xf32>
    %134 = vector.broadcast %133 : vector<8x1xf32> to vector<8x128xf32>
    %135 = arith.mulf %130, %134 : vector<8x128xf32>
    %136 = vector.broadcast %108 : vector<8x1xf32> to vector<8x128xf32>
    %137 = arith.mulf %135, %136 : vector<8x128xf32>
    %138 = vector.broadcast %109 : vector<8x1xf32> to vector<8x128xf32>
    %139 = arith.addf %137, %138 : vector<8x128xf32>
    %140 = math.tanh %139 : vector<8x128xf32>
    %c1144 = arith.constant 1144 : index
    %c0_36 = arith.constant 0 : index
    %141 = vector.load %arg2[%c1144, %c0_36] : memref<2448x128xf32, #tpu.memory_space<vmem>>, vector<1x64xf32>
    %c120 = arith.constant 120 : index
    %c0_37 = arith.constant 0 : index
    %142 = vector.load %arg2[%c120, %c0_37] : memref<2448x128xf32, #tpu.memory_space<vmem>>, vector<128x64xf32>
    %143 = vector.extract_strided_slice %140 {offsets = [0, 0], sizes = [1, 128], strides = [1, 1]} : vector<8x128xf32> to vector<1x128xf32>
    %cst_38 = arith.constant dense<0.000000e+00> : vector<1x64xf32>
    %144 = tpu.matmul %143, %142, %cst_38 {dimension_numbers = #tpu.dot_dimension_numbers<[1], [0], [0], [1], [0, 0, 1, 1], [], []>} : vector<1x128xf32>, vector<128x64xf32>, vector<1x64xf32> -> vector<1x64xf32>
    %145 = arith.addf %141, %144 : vector<1x64xf32>
    %c248 = arith.constant 248 : index
    %c0_39 = arith.constant 0 : index
    %146 = vector.load %arg2[%c248, %c0_39] : memref<2448x128xf32, #tpu.memory_space<vmem>>, vector<128x64xf32>
    %147 = vector.extract_strided_slice %140 {offsets = [1, 0], sizes = [1, 128], strides = [1, 1]} : vector<8x128xf32> to vector<1x128xf32>
    %cst_40 = arith.constant dense<0.000000e+00> : vector<1x64xf32>
    %148 = tpu.matmul %147, %146, %cst_40 {dimension_numbers = #tpu.dot_dimension_numbers<[1], [0], [0], [1], [0, 0, 1, 1], [], []>} : vector<1x128xf32>, vector<128x64xf32>, vector<1x64xf32> -> vector<1x64xf32>
    %149 = arith.addf %145, %148 : vector<1x64xf32>
    %c376 = arith.constant 376 : index
    %c0_41 = arith.constant 0 : index
    %150 = vector.load %arg2[%c376, %c0_41] : memref<2448x128xf32, #tpu.memory_space<vmem>>, vector<128x64xf32>
    %151 = vector.extract_strided_slice %140 {offsets = [2, 0], sizes = [1, 128], strides = [1, 1]} : vector<8x128xf32> to vector<1x128xf32>
    %cst_42 = arith.constant dense<0.000000e+00> : vector<1x64xf32>
    %152 = tpu.matmul %151, %150, %cst_42 {dimension_numbers = #tpu.dot_dimension_numbers<[1], [0], [0], [1], [0, 0, 1, 1], [], []>} : vector<1x128xf32>, vector<128x64xf32>, vector<1x64xf32> -> vector<1x64xf32>
    %153 = arith.addf %149, %152 : vector<1x64xf32>
    %c504 = arith.constant 504 : index
    %c0_43 = arith.constant 0 : index
    %154 = vector.load %arg2[%c504, %c0_43] : memref<2448x128xf32, #tpu.memory_space<vmem>>, vector<128x64xf32>
    %155 = vector.extract_strided_slice %140 {offsets = [3, 0], sizes = [1, 128], strides = [1, 1]} : vector<8x128xf32> to vector<1x128xf32>
    %cst_44 = arith.constant dense<0.000000e+00> : vector<1x64xf32>
    %156 = tpu.matmul %155, %154, %cst_44 {dimension_numbers = #tpu.dot_dimension_numbers<[1], [0], [0], [1], [0, 0, 1, 1], [], []>} : vector<1x128xf32>, vector<128x64xf32>, vector<1x64xf32> -> vector<1x64xf32>
    %157 = arith.addf %153, %156 : vector<1x64xf32>
    %c632 = arith.constant 632 : index
    %c0_45 = arith.constant 0 : index
    %158 = vector.load %arg2[%c632, %c0_45] : memref<2448x128xf32, #tpu.memory_space<vmem>>, vector<128x64xf32>
    %159 = vector.extract_strided_slice %140 {offsets = [4, 0], sizes = [1, 128], strides = [1, 1]} : vector<8x128xf32> to vector<1x128xf32>
    %cst_46 = arith.constant dense<0.000000e+00> : vector<1x64xf32>
    %160 = tpu.matmul %159, %158, %cst_46 {dimension_numbers = #tpu.dot_dimension_numbers<[1], [0], [0], [1], [0, 0, 1, 1], [], []>} : vector<1x128xf32>, vector<128x64xf32>, vector<1x64xf32> -> vector<1x64xf32>
    %161 = arith.addf %157, %160 : vector<1x64xf32>
    %c760 = arith.constant 760 : index
    %c0_47 = arith.constant 0 : index
    %162 = vector.load %arg2[%c760, %c0_47] : memref<2448x128xf32, #tpu.memory_space<vmem>>, vector<128x64xf32>
    %163 = vector.extract_strided_slice %140 {offsets = [5, 0], sizes = [1, 128], strides = [1, 1]} : vector<8x128xf32> to vector<1x128xf32>
    %cst_48 = arith.constant dense<0.000000e+00> : vector<1x64xf32>
    %164 = tpu.matmul %163, %162, %cst_48 {dimension_numbers = #tpu.dot_dimension_numbers<[1], [0], [0], [1], [0, 0, 1, 1], [], []>} : vector<1x128xf32>, vector<128x64xf32>, vector<1x64xf32> -> vector<1x64xf32>
    %165 = arith.addf %161, %164 : vector<1x64xf32>
    %c888 = arith.constant 888 : index
    %c0_49 = arith.constant 0 : index
    %166 = vector.load %arg2[%c888, %c0_49] : memref<2448x128xf32, #tpu.memory_space<vmem>>, vector<128x64xf32>
    %167 = vector.extract_strided_slice %140 {offsets = [6, 0], sizes = [1, 128], strides = [1, 1]} : vector<8x128xf32> to vector<1x128xf32>
    %cst_50 = arith.constant dense<0.000000e+00> : vector<1x64xf32>
    %168 = tpu.matmul %167, %166, %cst_50 {dimension_numbers = #tpu.dot_dimension_numbers<[1], [0], [0], [1], [0, 0, 1, 1], [], []>} : vector<1x128xf32>, vector<128x64xf32>, vector<1x64xf32> -> vector<1x64xf32>
    %169 = arith.addf %165, %168 : vector<1x64xf32>
    %c1016 = arith.constant 1016 : index
    %c0_51 = arith.constant 0 : index
    %170 = vector.load %arg2[%c1016, %c0_51] : memref<2448x128xf32, #tpu.memory_space<vmem>>, vector<128x64xf32>
    %171 = vector.extract_strided_slice %140 {offsets = [7, 0], sizes = [1, 128], strides = [1, 1]} : vector<8x128xf32> to vector<1x128xf32>
    %cst_52 = arith.constant dense<0.000000e+00> : vector<1x64xf32>
    %172 = tpu.matmul %171, %170, %cst_52 {dimension_numbers = #tpu.dot_dimension_numbers<[1], [0], [0], [1], [0, 0, 1, 1], [], []>} : vector<1x128xf32>, vector<128x64xf32>, vector<1x64xf32> -> vector<1x64xf32>
    %173 = arith.addf %169, %172 : vector<1x64xf32>
    %174 = math.tanh %173 : vector<1x64xf32>
    %c1152 = arith.constant 1152 : index
    %c0_53 = arith.constant 0 : index
    %175 = vector.load %arg2[%c1152, %c0_53] : memref<2448x128xf32, #tpu.memory_space<vmem>>, vector<64x128xf32>
    %cst_54 = arith.constant dense<0.000000e+00> : vector<1x128xf32>
    %176 = tpu.matmul %174, %175, %cst_54 {dimension_numbers = #tpu.dot_dimension_numbers<[1], [0], [0], [1], [0, 0, 1, 1], [], []>} : vector<1x64xf32>, vector<64x128xf32>, vector<1x128xf32> -> vector<1x128xf32>
    %c1216 = arith.constant 1216 : index
    %c0_55 = arith.constant 0 : index
    %177 = vector.load %arg2[%c1216, %c0_55] : memref<2448x128xf32, #tpu.memory_space<vmem>>, vector<64x128xf32>
    %cst_56 = arith.constant dense<0.000000e+00> : vector<1x128xf32>
    %178 = tpu.matmul %174, %177, %cst_56 {dimension_numbers = #tpu.dot_dimension_numbers<[1], [0], [0], [1], [0, 0, 1, 1], [], []>} : vector<1x64xf32>, vector<64x128xf32>, vector<1x128xf32> -> vector<1x128xf32>
    %c1280 = arith.constant 1280 : index
    %c0_57 = arith.constant 0 : index
    %179 = vector.load %arg2[%c1280, %c0_57] : memref<2448x128xf32, #tpu.memory_space<vmem>>, vector<64x128xf32>
    %cst_58 = arith.constant dense<0.000000e+00> : vector<1x128xf32>
    %180 = tpu.matmul %174, %179, %cst_58 {dimension_numbers = #tpu.dot_dimension_numbers<[1], [0], [0], [1], [0, 0, 1, 1], [], []>} : vector<1x64xf32>, vector<64x128xf32>, vector<1x128xf32> -> vector<1x128xf32>
    %c1344 = arith.constant 1344 : index
    %c0_59 = arith.constant 0 : index
    %181 = vector.load %arg2[%c1344, %c0_59] : memref<2448x128xf32, #tpu.memory_space<vmem>>, vector<64x128xf32>
    %cst_60 = arith.constant dense<0.000000e+00> : vector<1x128xf32>
    %182 = tpu.matmul %174, %181, %cst_60 {dimension_numbers = #tpu.dot_dimension_numbers<[1], [0], [0], [1], [0, 0, 1, 1], [], []>} : vector<1x64xf32>, vector<64x128xf32>, vector<1x128xf32> -> vector<1x128xf32>
    %c1408 = arith.constant 1408 : index
    %c0_61 = arith.constant 0 : index
    %183 = vector.load %arg2[%c1408, %c0_61] : memref<2448x128xf32, #tpu.memory_space<vmem>>, vector<64x128xf32>
    %cst_62 = arith.constant dense<0.000000e+00> : vector<1x128xf32>
    %184 = tpu.matmul %174, %183, %cst_62 {dimension_numbers = #tpu.dot_dimension_numbers<[1], [0], [0], [1], [0, 0, 1, 1], [], []>} : vector<1x64xf32>, vector<64x128xf32>, vector<1x128xf32> -> vector<1x128xf32>
    %c1472 = arith.constant 1472 : index
    %c0_63 = arith.constant 0 : index
    %185 = vector.load %arg2[%c1472, %c0_63] : memref<2448x128xf32, #tpu.memory_space<vmem>>, vector<64x128xf32>
    %cst_64 = arith.constant dense<0.000000e+00> : vector<1x128xf32>
    %186 = tpu.matmul %174, %185, %cst_64 {dimension_numbers = #tpu.dot_dimension_numbers<[1], [0], [0], [1], [0, 0, 1, 1], [], []>} : vector<1x64xf32>, vector<64x128xf32>, vector<1x128xf32> -> vector<1x128xf32>
    %c1536 = arith.constant 1536 : index
    %c0_65 = arith.constant 0 : index
    %187 = vector.load %arg2[%c1536, %c0_65] : memref<2448x128xf32, #tpu.memory_space<vmem>>, vector<64x128xf32>
    %cst_66 = arith.constant dense<0.000000e+00> : vector<1x128xf32>
    %188 = tpu.matmul %174, %187, %cst_66 {dimension_numbers = #tpu.dot_dimension_numbers<[1], [0], [0], [1], [0, 0, 1, 1], [], []>} : vector<1x64xf32>, vector<64x128xf32>, vector<1x128xf32> -> vector<1x128xf32>
    %c1600 = arith.constant 1600 : index
    %c0_67 = arith.constant 0 : index
    %189 = vector.load %arg2[%c1600, %c0_67] : memref<2448x128xf32, #tpu.memory_space<vmem>>, vector<64x128xf32>
    %cst_68 = arith.constant dense<0.000000e+00> : vector<1x128xf32>
    %190 = tpu.matmul %174, %189, %cst_68 {dimension_numbers = #tpu.dot_dimension_numbers<[1], [0], [0], [1], [0, 0, 1, 1], [], []>} : vector<1x64xf32>, vector<64x128xf32>, vector<1x128xf32> -> vector<1x128xf32>
    %c1664 = arith.constant 1664 : index
    %c0_69 = arith.constant 0 : index
    %191 = vector.load %arg2[%c1664, %c0_69] : memref<2448x128xf32, #tpu.memory_space<vmem>>, vector<64x128xf32>
    %cst_70 = arith.constant dense<0.000000e+00> : vector<1x128xf32>
    %192 = tpu.matmul %174, %191, %cst_70 {dimension_numbers = #tpu.dot_dimension_numbers<[1], [0], [0], [1], [0, 0, 1, 1], [], []>} : vector<1x64xf32>, vector<64x128xf32>, vector<1x128xf32> -> vector<1x128xf32>
    %c1728 = arith.constant 1728 : index
    %c0_71 = arith.constant 0 : index
    %193 = vector.load %arg2[%c1728, %c0_71] : memref<2448x128xf32, #tpu.memory_space<vmem>>, vector<64x128xf32>
    %cst_72 = arith.constant dense<0.000000e+00> : vector<1x128xf32>
    %194 = tpu.matmul %174, %193, %cst_72 {dimension_numbers = #tpu.dot_dimension_numbers<[1], [0], [0], [1], [0, 0, 1, 1], [], []>} : vector<1x64xf32>, vector<64x128xf32>, vector<1x128xf32> -> vector<1x128xf32>
    %c1792 = arith.constant 1792 : index
    %c0_73 = arith.constant 0 : index
    %195 = vector.load %arg2[%c1792, %c0_73] : memref<2448x128xf32, #tpu.memory_space<vmem>>, vector<64x128xf32>
    %cst_74 = arith.constant dense<0.000000e+00> : vector<1x128xf32>
    %196 = tpu.matmul %174, %195, %cst_74 {dimension_numbers = #tpu.dot_dimension_numbers<[1], [0], [0], [1], [0, 0, 1, 1], [], []>} : vector<1x64xf32>, vector<64x128xf32>, vector<1x128xf32> -> vector<1x128xf32>
    %c1856 = arith.constant 1856 : index
    %c0_75 = arith.constant 0 : index
    %197 = vector.load %arg2[%c1856, %c0_75] : memref<2448x128xf32, #tpu.memory_space<vmem>>, vector<64x128xf32>
    %cst_76 = arith.constant dense<0.000000e+00> : vector<1x128xf32>
    %198 = tpu.matmul %174, %197, %cst_76 {dimension_numbers = #tpu.dot_dimension_numbers<[1], [0], [0], [1], [0, 0, 1, 1], [], []>} : vector<1x64xf32>, vector<64x128xf32>, vector<1x128xf32> -> vector<1x128xf32>
    %c1920 = arith.constant 1920 : index
    %c0_77 = arith.constant 0 : index
    %199 = vector.load %arg2[%c1920, %c0_77] : memref<2448x128xf32, #tpu.memory_space<vmem>>, vector<64x128xf32>
    %cst_78 = arith.constant dense<0.000000e+00> : vector<1x128xf32>
    %200 = tpu.matmul %174, %199, %cst_78 {dimension_numbers = #tpu.dot_dimension_numbers<[1], [0], [0], [1], [0, 0, 1, 1], [], []>} : vector<1x64xf32>, vector<64x128xf32>, vector<1x128xf32> -> vector<1x128xf32>
    %c1984 = arith.constant 1984 : index
    %c0_79 = arith.constant 0 : index
    %201 = vector.load %arg2[%c1984, %c0_79] : memref<2448x128xf32, #tpu.memory_space<vmem>>, vector<64x128xf32>
    %cst_80 = arith.constant dense<0.000000e+00> : vector<1x128xf32>
    %202 = tpu.matmul %174, %201, %cst_80 {dimension_numbers = #tpu.dot_dimension_numbers<[1], [0], [0], [1], [0, 0, 1, 1], [], []>} : vector<1x64xf32>, vector<64x128xf32>, vector<1x128xf32> -> vector<1x128xf32>
    %c2048 = arith.constant 2048 : index
    %c0_81 = arith.constant 0 : index
    %203 = vector.load %arg2[%c2048, %c0_81] : memref<2448x128xf32, #tpu.memory_space<vmem>>, vector<64x128xf32>
    %cst_82 = arith.constant dense<0.000000e+00> : vector<1x128xf32>
    %204 = tpu.matmul %174, %203, %cst_82 {dimension_numbers = #tpu.dot_dimension_numbers<[1], [0], [0], [1], [0, 0, 1, 1], [], []>} : vector<1x64xf32>, vector<64x128xf32>, vector<1x128xf32> -> vector<1x128xf32>
    %c2112 = arith.constant 2112 : index
    %c0_83 = arith.constant 0 : index
    %205 = vector.load %arg2[%c2112, %c0_83] : memref<2448x128xf32, #tpu.memory_space<vmem>>, vector<64x128xf32>
    %cst_84 = arith.constant dense<0.000000e+00> : vector<1x128xf32>
    %206 = tpu.matmul %174, %205, %cst_84 {dimension_numbers = #tpu.dot_dimension_numbers<[1], [0], [0], [1], [0, 0, 1, 1], [], []>} : vector<1x64xf32>, vector<64x128xf32>, vector<1x128xf32> -> vector<1x128xf32>
    %207 = tpu.concatenate %176, %178, %180, %182, %184, %186, %188, %190, %192, %194, %196, %198, %200, %202, %204, %206 in 0 : vector<1x128xf32>, vector<1x128xf32>, vector<1x128xf32>, vector<1x128xf32>, vector<1x128xf32>, vector<1x128xf32>, vector<1x128xf32>, vector<1x128xf32>, vector<1x128xf32>, vector<1x128xf32>, vector<1x128xf32>, vector<1x128xf32>, vector<1x128xf32>, vector<1x128xf32>, vector<1x128xf32>, vector<1x128xf32> -> vector<16x128xf32>
    %c2176 = arith.constant 2176 : index
    %c0_85 = arith.constant 0 : index
    %208 = vector.load %arg2[%c2176, %c0_85] : memref<2448x128xf32, #tpu.memory_space<vmem>>, vector<16x128xf32>
    %209 = arith.addf %207, %208 : vector<16x128xf32>
    %210 = math.tanh %209 : vector<16x128xf32>
    %211 = tpu.concatenate %107, %107 in 0 : vector<8x128xf32>, vector<8x128xf32> -> vector<16x128xf32>
    %212 = arith.addf %210, %211 : vector<16x128xf32>
    %213 = vector.broadcast %113 : vector<1x128xf32> to vector<16x128xf32>
    %214 = arith.mulf %212, %213 : vector<16x128xf32>
    %c2272 = arith.constant 2272 : index
    %c0_86 = arith.constant 0 : index
    %215 = vector.load %arg2[%c2272, %c0_86] : memref<2448x128xf32, #tpu.memory_space<vmem>>, vector<8x16xf32>
    %cst_87 = arith.constant dense<0.000000e+00> : vector<8x128xf32>
    %216 = tpu.matmul %215, %214, %cst_87 {dimension_numbers = #tpu.dot_dimension_numbers<[1], [0], [0], [1], [0, 0, 1, 1], [], []>} : vector<8x16xf32>, vector<16x128xf32>, vector<8x128xf32> -> vector<8x128xf32>
    %c2280 = arith.constant 2280 : index
    %c0_88 = arith.constant 0 : index
    %217 = vector.load %arg2[%c2280, %c0_88] : memref<2448x128xf32, #tpu.memory_space<vmem>>, vector<8x16xf32>
    %cst_89 = arith.constant dense<0.000000e+00> : vector<8x128xf32>
    %218 = tpu.matmul %217, %214, %cst_89 {dimension_numbers = #tpu.dot_dimension_numbers<[1], [0], [0], [1], [0, 0, 1, 1], [], []>} : vector<8x16xf32>, vector<16x128xf32>, vector<8x128xf32> -> vector<8x128xf32>
    %c4_i32 = arith.constant 4 : i32
    %219 = tpu.dynamic_rotate %218 by %c4_i32 dim 1 : vector<8x128xf32>, i32 -> vector<8x128xf32>
    %220 = arith.addf %216, %219 : vector<8x128xf32>
    %c2288 = arith.constant 2288 : index
    %c0_90 = arith.constant 0 : index
    %221 = vector.load %arg2[%c2288, %c0_90] : memref<2448x128xf32, #tpu.memory_space<vmem>>, vector<8x1xf32>
    %222 = vector.broadcast %221 : vector<8x1xf32> to vector<8x128xf32>
    %223 = arith.addf %220, %222 : vector<8x128xf32>
    %c2296 = arith.constant 2296 : index
    %c0_91 = arith.constant 0 : index
    %224 = vector.load %arg2[%c2296, %c0_91] : memref<2448x128xf32, #tpu.memory_space<vmem>>, vector<8x1xf32>
    %c2304 = arith.constant 2304 : index
    %c0_92 = arith.constant 0 : index
    %225 = vector.load %arg2[%c2304, %c0_92] : memref<2448x128xf32, #tpu.memory_space<vmem>>, vector<8x1xf32>
    %226 = vector.broadcast %71 : vector<1x128xf32> to vector<8x128xf32>
    %227 = arith.mulf %223, %226 : vector<8x128xf32>
    %cst_93 = arith.constant dense<0.000000e+00> : vector<8xf32>
    %228 = vector.multi_reduction <add>, %227, %cst_93 [1] : vector<8x128xf32> to vector<8xf32>
    %229 = vector.shape_cast %228 : vector<8xf32> to vector<8x1xf32>
    %cst_94 = arith.constant 0.0172413792 : f32
    %230 = vector.broadcast %cst_94 : f32 to vector<8x1xf32>
    %231 = arith.mulf %229, %230 : vector<8x1xf32>
    %232 = vector.broadcast %231 : vector<8x1xf32> to vector<8x128xf32>
    %233 = arith.subf %223, %232 : vector<8x128xf32>
    %234 = vector.broadcast %71 : vector<1x128xf32> to vector<8x128xf32>
    %235 = arith.mulf %233, %234 : vector<8x128xf32>
    %236 = arith.mulf %235, %235 : vector<8x128xf32>
    %cst_95 = arith.constant dense<0.000000e+00> : vector<8xf32>
    %237 = vector.multi_reduction <add>, %236, %cst_95 [1] : vector<8x128xf32> to vector<8xf32>
    %238 = vector.shape_cast %237 : vector<8xf32> to vector<8x1xf32>
    %cst_96 = arith.constant 0.0172413792 : f32
    %239 = vector.broadcast %cst_96 : f32 to vector<8x1xf32>
    %240 = arith.mulf %238, %239 : vector<8x1xf32>
    %241 = vector.broadcast %231 : vector<8x1xf32> to vector<8x128xf32>
    %242 = arith.subf %223, %241 : vector<8x128xf32>
    %cst_97 = arith.constant 9.99999974E-6 : f32
    %243 = vector.broadcast %cst_97 : f32 to vector<8x1xf32>
    %244 = arith.addf %240, %243 : vector<8x1xf32>
    %245 = math.rsqrt %244 : vector<8x1xf32>
    %246 = vector.broadcast %245 : vector<8x1xf32> to vector<8x128xf32>
    %247 = arith.mulf %242, %246 : vector<8x128xf32>
    %248 = vector.broadcast %224 : vector<8x1xf32> to vector<8x128xf32>
    %249 = arith.mulf %247, %248 : vector<8x128xf32>
    %250 = vector.broadcast %225 : vector<8x1xf32> to vector<8x128xf32>
    %251 = arith.addf %249, %250 : vector<8x128xf32>
    %252 = math.tanh %251 : vector<8x128xf32>
    %253 = vector.broadcast %71 : vector<1x128xf32> to vector<8x128xf32>
    %254 = arith.mulf %252, %253 : vector<8x128xf32>
    %c2232 = arith.constant 2232 : index
    %c0_98 = arith.constant 0 : index
    %255 = vector.load %arg2[%c2232, %c0_98] : memref<2448x128xf32, #tpu.memory_space<vmem>>, vector<4x8xf32>
    %cst_99 = arith.constant dense<0.000000e+00> : vector<4x128xf32>
    %256 = tpu.matmul %255, %254, %cst_99 {dimension_numbers = #tpu.dot_dimension_numbers<[1], [0], [0], [1], [0, 0, 1, 1], [], []>} : vector<4x8xf32>, vector<8x128xf32>, vector<4x128xf32> -> vector<4x128xf32>
    %c2240 = arith.constant 2240 : index
    %c0_100 = arith.constant 0 : index
    %257 = vector.load %arg2[%c2240, %c0_100] : memref<2448x128xf32, #tpu.memory_space<vmem>>, vector<4x8xf32>
    %cst_101 = arith.constant dense<0.000000e+00> : vector<4x128xf32>
    %258 = tpu.matmul %257, %254, %cst_101 {dimension_numbers = #tpu.dot_dimension_numbers<[1], [0], [0], [1], [0, 0, 1, 1], [], []>} : vector<4x8xf32>, vector<8x128xf32>, vector<4x128xf32> -> vector<4x128xf32>
    %c2_i32 = arith.constant 2 : i32
    %259 = tpu.dynamic_rotate %258 by %c2_i32 dim 1 : vector<4x128xf32>, i32 -> vector<4x128xf32>
    %260 = arith.addf %256, %259 : vector<4x128xf32>
    %c2248 = arith.constant 2248 : index
    %c0_102 = arith.constant 0 : index
    %261 = vector.load %arg2[%c2248, %c0_102] : memref<2448x128xf32, #tpu.memory_space<vmem>>, vector<4x1xf32>
    %262 = vector.broadcast %261 : vector<4x1xf32> to vector<4x128xf32>
    %263 = arith.addf %260, %262 : vector<4x128xf32>
    %c2256 = arith.constant 2256 : index
    %c0_103 = arith.constant 0 : index
    %264 = vector.load %arg2[%c2256, %c0_103] : memref<2448x128xf32, #tpu.memory_space<vmem>>, vector<4x1xf32>
    %c2264 = arith.constant 2264 : index
    %c0_104 = arith.constant 0 : index
    %265 = vector.load %arg2[%c2264, %c0_104] : memref<2448x128xf32, #tpu.memory_space<vmem>>, vector<4x1xf32>
    %266 = vector.broadcast %29 : vector<1x128xf32> to vector<4x128xf32>
    %267 = arith.mulf %263, %266 : vector<4x128xf32>
    %cst_105 = arith.constant dense<0.000000e+00> : vector<4xf32>
    %268 = vector.multi_reduction <add>, %267, %cst_105 [1] : vector<4x128xf32> to vector<4xf32>
    %269 = vector.shape_cast %268 : vector<4xf32> to vector<4x1xf32>
    %cst_106 = arith.constant 0.0161290318 : f32
    %270 = vector.broadcast %cst_106 : f32 to vector<4x1xf32>
    %271 = arith.mulf %269, %270 : vector<4x1xf32>
    %272 = vector.broadcast %271 : vector<4x1xf32> to vector<4x128xf32>
    %273 = arith.subf %263, %272 : vector<4x128xf32>
    %274 = vector.broadcast %29 : vector<1x128xf32> to vector<4x128xf32>
    %275 = arith.mulf %273, %274 : vector<4x128xf32>
    %276 = arith.mulf %275, %275 : vector<4x128xf32>
    %cst_107 = arith.constant dense<0.000000e+00> : vector<4xf32>
    %277 = vector.multi_reduction <add>, %276, %cst_107 [1] : vector<4x128xf32> to vector<4xf32>
    %278 = vector.shape_cast %277 : vector<4xf32> to vector<4x1xf32>
    %cst_108 = arith.constant 0.0161290318 : f32
    %279 = vector.broadcast %cst_108 : f32 to vector<4x1xf32>
    %280 = arith.mulf %278, %279 : vector<4x1xf32>
    %281 = vector.broadcast %271 : vector<4x1xf32> to vector<4x128xf32>
    %282 = arith.subf %263, %281 : vector<4x128xf32>
    %cst_109 = arith.constant 9.99999974E-6 : f32
    %283 = vector.broadcast %cst_109 : f32 to vector<4x1xf32>
    %284 = arith.addf %280, %283 : vector<4x1xf32>
    %285 = math.rsqrt %284 : vector<4x1xf32>
    %286 = vector.broadcast %285 : vector<4x1xf32> to vector<4x128xf32>
    %287 = arith.mulf %282, %286 : vector<4x128xf32>
    %288 = vector.broadcast %264 : vector<4x1xf32> to vector<4x128xf32>
    %289 = arith.mulf %287, %288 : vector<4x128xf32>
    %290 = vector.broadcast %265 : vector<4x1xf32> to vector<4x128xf32>
    %291 = arith.addf %289, %290 : vector<4x128xf32>
    %292 = math.tanh %291 : vector<4x128xf32>
    %293 = vector.broadcast %29 : vector<1x128xf32> to vector<4x128xf32>
    %294 = arith.mulf %292, %293 : vector<4x128xf32>
    %c2192 = arith.constant 2192 : index
    %c0_110 = arith.constant 0 : index
    %295 = vector.load %arg2[%c2192, %c0_110] : memref<2448x128xf32, #tpu.memory_space<vmem>>, vector<2x4xf32>
    %cst_111 = arith.constant dense<0.000000e+00> : vector<2x128xf32>
    %296 = tpu.matmul %295, %294, %cst_111 {dimension_numbers = #tpu.dot_dimension_numbers<[1], [0], [0], [1], [0, 0, 1, 1], [], []>} : vector<2x4xf32>, vector<4x128xf32>, vector<2x128xf32> -> vector<2x128xf32>
    %c2200 = arith.constant 2200 : index
    %c0_112 = arith.constant 0 : index
    %297 = vector.load %arg2[%c2200, %c0_112] : memref<2448x128xf32, #tpu.memory_space<vmem>>, vector<2x4xf32>
    %cst_113 = arith.constant dense<0.000000e+00> : vector<2x128xf32>
    %298 = tpu.matmul %297, %294, %cst_113 {dimension_numbers = #tpu.dot_dimension_numbers<[1], [0], [0], [1], [0, 0, 1, 1], [], []>} : vector<2x4xf32>, vector<4x128xf32>, vector<2x128xf32> -> vector<2x128xf32>
    %c1_i32 = arith.constant 1 : i32
    %299 = tpu.dynamic_rotate %298 by %c1_i32 dim 1 : vector<2x128xf32>, i32 -> vector<2x128xf32>
    %300 = arith.addf %296, %299 : vector<2x128xf32>
    %c2208 = arith.constant 2208 : index
    %c0_114 = arith.constant 0 : index
    %301 = vector.load %arg2[%c2208, %c0_114] : memref<2448x128xf32, #tpu.memory_space<vmem>>, vector<2x1xf32>
    %302 = vector.broadcast %301 : vector<2x1xf32> to vector<2x128xf32>
    %303 = arith.addf %300, %302 : vector<2x128xf32>
    %c2216 = arith.constant 2216 : index
    %c0_115 = arith.constant 0 : index
    %304 = vector.load %arg2[%c2216, %c0_115] : memref<2448x128xf32, #tpu.memory_space<vmem>>, vector<2x1xf32>
    %c2224 = arith.constant 2224 : index
    %c0_116 = arith.constant 0 : index
    %305 = vector.load %arg2[%c2224, %c0_116] : memref<2448x128xf32, #tpu.memory_space<vmem>>, vector<2x1xf32>
    %306 = vector.extract_strided_slice %303 {offsets = [0, 0], sizes = [1, 128], strides = [1, 1]} : vector<2x128xf32> to vector<1x128xf32>
    %307 = vector.extract_strided_slice %304 {offsets = [0, 0], sizes = [1, 1], strides = [1, 1]} : vector<2x1xf32> to vector<1x1xf32>
    %308 = vector.extract_strided_slice %305 {offsets = [0, 0], sizes = [1, 1], strides = [1, 1]} : vector<2x1xf32> to vector<1x1xf32>
    %c32_i32 = arith.constant 32 : i32
    %309 = vector.broadcast %c32_i32 : i32 to vector<1x128xi32>
    %310 = arith.cmpi slt, %2, %309 : vector<1x128xi32>
    %311 = arith.extui %310 : vector<1x128xi1> to vector<1x128xi32>
    %312 = arith.sitofp %311 : vector<1x128xi32> to vector<1x128xf32>
    %313 = arith.mulf %306, %312 : vector<1x128xf32>
    %cst_117 = arith.constant dense<0.000000e+00> : vector<1xf32>
    %314 = vector.multi_reduction <add>, %313, %cst_117 [1] : vector<1x128xf32> to vector<1xf32>
    %315 = vector.shape_cast %314 : vector<1xf32> to vector<1x1xf32>
    %cst_118 = arith.constant 1.562500e-02 : f32
    %316 = vector.broadcast %cst_118 : f32 to vector<1x1xf32>
    %317 = arith.mulf %315, %316 : vector<1x1xf32>
    %318 = vector.broadcast %317 : vector<1x1xf32> to vector<1x128xf32>
    %319 = arith.subf %306, %318 : vector<1x128xf32>
    %320 = arith.mulf %319, %312 : vector<1x128xf32>
    %321 = arith.mulf %320, %320 : vector<1x128xf32>
    %cst_119 = arith.constant dense<0.000000e+00> : vector<1xf32>
    %322 = vector.multi_reduction <add>, %321, %cst_119 [1] : vector<1x128xf32> to vector<1xf32>
    %323 = vector.shape_cast %322 : vector<1xf32> to vector<1x1xf32>
    %cst_120 = arith.constant 1.562500e-02 : f32
    %324 = vector.broadcast %cst_120 : f32 to vector<1x1xf32>
    %325 = arith.mulf %323, %324 : vector<1x1xf32>
    %326 = vector.broadcast %317 : vector<1x1xf32> to vector<1x128xf32>
    %327 = arith.subf %306, %326 : vector<1x128xf32>
    %cst_121 = arith.constant 9.99999974E-6 : f32
    %328 = vector.broadcast %cst_121 : f32 to vector<1x1xf32>
    %329 = arith.addf %325, %328 : vector<1x1xf32>
    %330 = math.rsqrt %329 : vector<1x1xf32>
    %331 = vector.broadcast %330 : vector<1x1xf32> to vector<1x128xf32>
    %332 = arith.mulf %327, %331 : vector<1x128xf32>
    %333 = vector.broadcast %307 : vector<1x1xf32> to vector<1x128xf32>
    %334 = arith.mulf %332, %333 : vector<1x128xf32>
    %335 = vector.broadcast %308 : vector<1x1xf32> to vector<1x128xf32>
    %336 = arith.addf %334, %335 : vector<1x128xf32>
    %337 = math.tanh %336 : vector<1x128xf32>
    %c2 = arith.constant 2 : index
    %338 = memref.load %arg1[%c2] : memref<6xf32, #tpu.memory_space<smem>>
    %339 = vector.broadcast %338 : f32 to vector<1x128xf32>
    %340 = arith.mulf %337, %339 : vector<1x128xf32>
    %c3 = arith.constant 3 : index
    %341 = memref.load %arg1[%c3] : memref<6xf32, #tpu.memory_space<smem>>
    %342 = vector.broadcast %341 : f32 to vector<1x128xf32>
    %343 = arith.addf %340, %342 : vector<1x128xf32>
    %344 = vector.extract_strided_slice %303 {offsets = [1, 0], sizes = [1, 128], strides = [1, 1]} : vector<2x128xf32> to vector<1x128xf32>
    %c4 = arith.constant 4 : index
    %345 = memref.load %arg1[%c4] : memref<6xf32, #tpu.memory_space<smem>>
    %346 = vector.broadcast %345 : f32 to vector<1x128xf32>
    %347 = arith.mulf %344, %346 : vector<1x128xf32>
    %c5 = arith.constant 5 : index
    %348 = memref.load %arg1[%c5] : memref<6xf32, #tpu.memory_space<smem>>
    %349 = vector.broadcast %348 : f32 to vector<1x128xf32>
    %350 = arith.addf %347, %349 : vector<1x128xf32>
    %351 = math.tanh %350 : vector<1x128xf32>
    %c2312 = arith.constant 2312 : index
    %c0_122 = arith.constant 0 : index
    %352 = vector.load %arg2[%c2312, %c0_122] : memref<2448x128xf32, #tpu.memory_space<vmem>>, vector<128x16xf32>
    %cst_123 = arith.constant dense<0.000000e+00> : vector<1x16xf32>
    %353 = tpu.matmul %351, %352, %cst_123 {dimension_numbers = #tpu.dot_dimension_numbers<[1], [0], [0], [1], [0, 0, 1, 1], [], []>} : vector<1x128xf32>, vector<128x16xf32>, vector<1x16xf32> -> vector<1x16xf32>
    %c2440 = arith.constant 2440 : index
    %c0_124 = arith.constant 0 : index
    %354 = vector.load %arg2[%c2440, %c0_124] : memref<2448x128xf32, #tpu.memory_space<vmem>>, vector<1x16xf32>
    %355 = arith.addf %353, %354 : vector<1x16xf32>
    %cst_125 = arith.constant 0.000000e+00 : f32
    %356 = vector.broadcast %cst_125 : f32 to vector<1x112xf32>
    %357 = tpu.concatenate %355, %356 in 1 : vector<1x16xf32>, vector<1x112xf32> -> vector<1x128xf32>
    %358 = tpu.concatenate %343, %357 in 0 : vector<1x128xf32>, vector<1x128xf32> -> vector<2x128xf32>
    %c0_126 = arith.constant 0 : index
    %c0_127 = arith.constant 0 : index
    %359 = vector.load %arg3[%c0_126, %c0_127] : memref<2x128xf32, #tpu.memory_space<vmem>>, vector<2x128xf32>
    tpu.vector_store %arg3[%c0_126, %c0_127], %358 {strides = array<i32>} : memref<2x128xf32, #tpu.memory_space<vmem>>, vector<2x128xf32>,
    return
  }
}

</mosaic_0001>

<bundles_post_ra>
// kernel: squeeze.2
= control target key start
LH: loop header
LB: loop body
LE: loop exit
PB: predicated region body
PF: predicated region fallthrough
CT: control target
= control target key end

     0   :  { %s80_s0 = inlined_call_operand.vmem [shape: f32[128], index: 0, kind: input, shape index: {}]   ;;  %s81_s1 = inlined_call_operand.hbm [shape: f32[2,64], index: 1, kind: output, shape index: {}]  }
   0x1   :  { %v5_v0 = vld [vmem:[%s80_s0] sm:$0x1] }
   0x2   :  { %2 = vsyncpa [#allocation1], 0  ;;  %6 = vst [vmem:[#allocation3] sm:$0x1] %v5_v0  ;;  %vm8_vm0 = vcmask 523264   ;;  %s62_s0 = smov 64  }
   0x3   :  { %s63_s8 = smov [#allocation0]   ;;  %s27_s1 = sshll.u32 %s81_s1, 4  ;;  %s28_s1 = int_to_ptr.hbm [resolvable:$true] %s27_s1 }
   0x4   :  { %s25_s9 = sshll.u32 %s63_s8, 4  ;;  %s26_s9 = int_to_ptr.vmem [resolvable:$true] %s25_s9 }
   0x9   :  { %v10_v1 = vld [vmem:[#allocation3] sm:$0x1]  }
   0xa   :  { %v7_v2 = vld [vmem:[#allocation3] sm:$0x1]   ;;  %11 = vrot.lane.b32.xlu0 %v10_v1, %s62_s0 }
   0xb   :  { %9 = vst.msk [vmem:[#allocation2] sm:$0x1] %vm8_vm0, %v7_v2  }
  0x7c   :  { %v12_v3 = vpop.permute.xlu0 %11  }
  0x7d   :  { %15 = vst.msk [vmem:[#allocation2 + $0x1] sm:$0x1] %vm8_vm0, %v12_v3  }
  0x84   :  { %v18_v4 = vld [vmem:[#allocation2] sm:$0x3] }
  0x85   :  { %21 = vst [vmem:[#allocation0] sm:$0x3] %v18_v4 }
  0x86   :  { %30 = dma.vmem_to_hbm [thread:$0]  %s26_s9, 32, %s28_s1, [#allocation1]  }
  0x87   :  { %60 = dma.done.wait [#allocation1], 32  }
  0x88   :  { %61 = vsyncadd [#allocation1], 4294967264 }
  0x89   :  { %33 = vsyncpa [#allocation1], 1 }

// kernel: squeeze.3
= control target key start
LH: loop header
LB: loop body
LE: loop exit
PB: predicated region body
PF: predicated region fallthrough
CT: control target
= control target key end

     0   :  { %s80_s0 = inlined_call_operand.vmem [shape: f32[16], index: 0, kind: input, shape index: {}]   ;;  %s81_s1 = inlined_call_operand.hbm [shape: f32[2,1,8], index: 1, kind: output, shape index: {}]  }
   0x1   :  { %v5_v0 = vld [vmem:[%s80_s0] sm:$0x1] }
   0x2   :  { %2 = vsyncpa [#allocation1], 0  ;;  %6 = vst [vmem:[#allocation3] sm:$0x1] %v5_v0  ;;  %vm8_vm0 = vcmask 64512   ;;  %s62_s0 = smov 120  }
   0x3   :  { %s63_s8 = smov [#allocation0]   ;;  %s27_s1 = sshll.u32 %s81_s1, 4  ;;  %s28_s1 = int_to_ptr.hbm [resolvable:$true] %s27_s1 }
   0x4   :  { %s25_s9 = sshll.u32 %s63_s8, 4  ;;  %s26_s9 = int_to_ptr.vmem [resolvable:$true] %s25_s9 }
   0x9   :  { %v10_v1 = vld [vmem:[#allocation3] sm:$0x1]  }
   0xa   :  { %v7_v2 = vld [vmem:[#allocation3] sm:$0x1]   ;;  %11 = vrot.lane.b32.xlu0 %v10_v1, %s62_s0 }
   0xb   :  { %9 = vst.msk [vmem:[#allocation2] sm:$0x1] %vm8_vm0, %v7_v2  }
  0x7c   :  { %v12_v3 = vpop.permute.xlu0 %11  }
  0x7d   :  { %15 = vst.msk [vmem:[#allocation2 + $0x1] sm:$0x1] %vm8_vm0, %v12_v3  }
  0x84   :  { %v18_v4 = vld [vmem:[#allocation2] sm:$0x3] }
  0x85   :  { %21 = vst [vmem:[#allocation0] sm:$0x3] %v18_v4 }
  0x86   :  { %30 = dma.vmem_to_hbm [thread:$0]  %s26_s9, 32, %s28_s1, [#allocation1]  }
  0x87   :  { %60 = dma.done.wait [#allocation1], 32  }
  0x88   :  { %61 = vsyncadd [#allocation1], 4294967264 }
  0x89   :  { %33 = vsyncpa [#allocation1], 1 }

// kernel: autoencoder_forward.1
= control target key start
LH: loop header
LB: loop body
LE: loop exit
PB: predicated region body
PF: predicated region fallthrough
CT: control target
= control target key end

     0   :  { %8 = vsyncpa [#allocation4], 0  ;;  %s1817_s0 = inlined_call_operand.vmem [shape: f32[1,128], index: 0, kind: input, shape index: {}]   ;;  %s1818_s1 = inlined_call_operand.hbm [shape: f32[6], index: 1, kind: input, shape index: {}]   ;;  %s1819_s2 = inlined_call_operand.hbm [shape: f32[2448,128], index: 2, kind: input, shape index: {}]   ;;  %s1820_s3 = inlined_call_operand.vmem [shape: f32[2,128], index: 3, kind: output, shape index: {}]  }
   0x1   :  { %s17_s14 = sshll.u32 %s1818_s1, 4  ;;  %s18_s14 = int_to_ptr.hbm [resolvable:$true] %s17_s14 }
   0x2   :  { %9 = vsyncpa [#allocation3], 0  ;;  %s25_s17 = sshll.u32 %s1819_s2, 4  ;;  %s1663_s18 = smov [#allocation2]   ;;  %s26_s17 = int_to_ptr.hbm [resolvable:$true] %s25_s17 }
   0x3   :  { %20 = dma.hbm_to_smem %s18_s14, 16, %s1663_s18, [#allocation4]  }
   0x4   :  { %s1664_s19 = smov [#allocation5]   ;;  %s1665_s21 = smov 128  }
   0x5   :  { %s27_s20 = sshll.u32 %s1664_s19, 4  ;;  %s1666_s22 = smov 8   ;;  %s28_s20 = int_to_ptr.vmem [resolvable:$true] %s27_s20 }
   0x6   :  { %33 = dma.hbm_to_vmem [thread:$0]  %s26_s17, 39168, %s28_s20, [#allocation3], %s1665_s21, %s1665_s21, %s1666_s22  }
   0x7   :  { %1659 = dma.done.wait [#allocation4], 16  }
   0x8   :  { %1660 = vsyncadd [#allocation4], 4294967280 }
   0x9   :  { %1661 = dma.done.wait [#allocation3], 39168  }
   0xa   :  { %1662 = vsyncadd [#allocation3], 4294928128 }
   0xb   :  { %42 = sfence }
   0xc   :  { %v66_v0 = vld [vmem:[#allocation5 + $0x8] sm:$0x3]  ;;  %v1667_v1 = vmov 0   ;;  %s47_s1 = sld [smem:[#allocation2]]  ;;  %v46_v2 = vld [vmem:[%s1817_s0] sm:$0x1]  ;;  %v43_v12 = vlaneseq }
   0xd   :  { %1587 = vset.pattern.permute.xlu1 %v1667_v1  ;;  %1586 = vset.pattern.permute.xlu0 %v1667_v1  ;;  %s1533_s2 = sld [smem:[#allocation2 + $0x1]]  ;;  %v75_v3 = vld [vmem:[#allocation5 + $0x10] sm:$0x3]  ;;  %v82_v8 = vld [vmem:[#allocation5 + $0x18] sm:$0x3]  ;;  %s1668_s25 = smov 127  }
   0xe   :  { %69 = vperm.xlu1 %1587, %v66_v0   ;;  %1588 = vset.pattern.permute.xlu2 %v1667_v1  ;;  %v182_v10 = vld [vmem:[#allocation5 + $0x38] sm:$0xf]  ;;  %v56_v11 = vld [vmem:[#allocation5] sm:$0x3]  ;;  %v44_v14 = vand.u32 127, %v43_v12  ;;  %v1669_v24 = vmov 0.0  }
   0xf   :  { %vm88_vm1 = vcmask 1041408   ;;  %v83_v35 = vld [vmem:[#allocation5 + $0x20] sm:$0x3]  ;;  %v190_v37 = vld [vmem:[#allocation5 + $0x48] sm:$0xf]  ;;  %s1670_s0 = smov 126  }
  0x10   :  { %v1704_v18 = vand.u32 63, %v44_v14  ;;  %v189_v36 = vld [vmem:[#allocation5 + $0x40] sm:$0xf]  ;;  %vm129_vm5 = vcmask 15360   ;;  %v127_v54 = vld [vmem:[#allocation5 + $0x28] sm:$0xf] }
  0x11   :  { %v128_v55 = vld [vmem:[#allocation5 + $0x30] sm:$0xf]  ;;  %vm195_vm7 = vcmask 1043456   ;;  %s1671_s26 = smov 124   ;;  %vm236_vm11 = vcmask 31744   ;;  %s1672_s27 = smov 4  }
  0x12   :  { %v48_v4 = vstv %s47_s1  ;;  %vm84_vm0 = vcmp.lt.s32.totalorder %v1704_v18, 31  ;;  %vm191_vm6 = vcmp.lt.s32.totalorder %v1704_v18, 29  ;;  %vm298_vm12 = vcmp.lt.s32.totalorder %v1704_v18, 25  ;;  %s1673_s28 = smov 2   ;;  %s1674_s29 = smov 1  }
  0x13   :  { %v49_v5 = vmul.f32 %v48_v4, %v46_v2  ;;  %v51_v6 = vstv %s1533_s2  ;;  %v1708_v25 = vsel %vm84_vm0, 1.0, %v1669_v24  ;;  %v1718_v61 = vsel %vm191_vm6, 1.0, %v1669_v24  ;;  %s1572_s30 = sld [smem:[#allocation2 + $0x4]] }
  0x14   :  { %vm657_vm0 = vcmask 523264   ;;  %vm1153_vm6 = vcmask 1046528   ;;  %s1573_s4 = sld [smem:[#allocation2 + $0x5]] }
  0x15   :  { %v52_v7 = vadd.f32 %v51_v6, %v49_v5  ;;  %s1570_s5 = sld [smem:[#allocation2 + $0x2]] }
  0x16   :  { %78 = vperm.xlu1 %1587, %v75_v3   ;;  %s1571_s6 = sld [smem:[#allocation2 + $0x3]] }
  0x17   :  { %1589 = vtanh.f32 %v52_v7  ;;  %v296_v7 = vld [vmem:[#allocation5 + $0x68] sm:$0xff] }
  0x1d   :  { %v1590_v9 = vpop.eup %1589 }
  0x1e   :  { %114 = vperm.xlu1 %1587, %v82_v8   ;;  %54 = vrot.lane.b32.xlu0 %v1590_v9, %s1668_s25  ;;  %v63_v17 = vperm.slane %v1590_v9, 0 }
  0x26   :  { %185 = vperm.xlu1 %1587, %v182_v10   ;;  %59 = vperm.xlu0 %1586, %v56_v11  }
  0x80   :  { %v70_v15 = vpop.permute.xlu1 %69 }
  0x88   :  { %v79_v23 = vpop.permute.xlu1 %78 }
  0x90   :  { %v55_v13 = vpop.permute.xlu0 %54  ;;  %v115_v49 = vpop.permute.xlu1 %114 }
  0x91   :  { %v72_v16 = vperm.slane %v55_v13, 0 }
  0x93   :  { %v73_v20 = vmul.f32 %v72_v16, %v70_v15 }
  0x98   :  { %v60_v19 = vpop.permute.xlu0 %59  ;;  %v186_v60 = vpop.permute.xlu1 %185 }
  0x99   :  { %v65_v21 = vmul.f32 %v63_v17, %v60_v19 }
  0x9b   :  { %v74_v22 = vadd.f32 %v73_v20, %v65_v21 }
  0x9d   :  { %v81_v26 = vadd.f32 %v79_v23, %v74_v22 }
  0x9f   :  { %v87_v27 = vmul.f32 %v1708_v25, %v81_v26 }
  0xa1   :  { %v89_v28 = vsel %vm88_vm1, %v87_v27, 0.0  ;;  %v289_v27 = vld [vmem:[#allocation5 + $0x60] sm:$0xff] }
  0xa2   :  { %90 = vadd.xlane.f32.xlu2 %v89_v28  ;;  %v234_v28 = vld [vmem:[#allocation5 + $0x50] sm:$0xff] }
 0x115   :  { %v91_v29 = vpop.xlane.xlu2 %90 }
 0x116   :  { %v92_v30 = vmul.f32 0.016129032, %v91_v29  ;;  %v235_v29 = vld [vmem:[#allocation5 + $0x58] sm:$0xff] }
 0x118   :  { %v93_v31 = vsub.f32 %v81_v26, %v92_v30 }
 0x11a   :  { %v94_v32 = vmul.f32 %v1708_v25, %v93_v31 }
 0x11c   :  { %v95_v33 = vmul.f32 %v94_v32, %v94_v32 }
 0x11e   :  { %v96_v34 = vsel %vm88_vm1, %v95_v33, 0.0 }
 0x11f   :  { %97 = vadd.xlane.f32.xlu2 %v96_v34 }
 0x137   :  { %120 = vperm.xlu2 %1588, %v83_v35   ;;  %v1730_v35 = vsel %vm298_vm12, 1.0, %v1669_v24  ;;  %vm1270_vm12 = vcmask 64512  }
 0x13f   :  { %221 = vperm.xlu2 %1588, %v189_v36  }
 0x147   :  { %227 = vperm.xlu2 %1588, %v190_v37  }
 0x192   :  { %v98_v38 = vpop.xlane.xlu2 %97 }
 0x193   :  { %v99_v39 = vmul.f32 0.016129032, %v98_v38  ;;  %v1230_v38 = vld [vmem:[#allocation5 + $0x8f8] sm:$0xff] }
 0x195   :  { %v100_v40 = vadd.f32 1e-05, %v99_v39  ;;  %v1231_v39 = vld [vmem:[#allocation5 + $0x900] sm:$0xff] }
 0x197   :  { %1591 = vrsqrt.f32 %v100_v40  ;;  %vm107_vm3 = vweird.f32 %v100_v40 }
 0x19a   :  { %v121_v51 = vpop.permute.xlu2 %120 }
 0x19d   :  { %v1592_v41 = vpop.eup %1591 }
 0x19e   :  { %v102_v42 = vmul.f32 %v1592_v41, %v100_v40  ;;  %vm108_vm2 = vweird.f32 %v1592_v41 }
 0x19f   :  { %vm109_vm4 = vmor %vm107_vm3, %vm108_vm2  ;;  %vm1143_vm2 = vcmask 1040384   ;;  %vm1146_vm3 = vcmask 1042432  }
 0x1a0   :  { %v103_v43 = vmul.f32 %v1592_v41, %v102_v42 }
 0x1a2   :  { %v104_v44 = vmul.f32 0.5, %v103_v43  ;;  %v222_v14 = vpop.permute.xlu2 %221 }
 0x1a4   :  { %v105_v45 = vsub.f32 1.5, %v104_v44  ;;  %v352_v44 = vld [vmem:[#allocation5 + $0xf0] sm:$0xff] }
 0x1a6   :  { %v106_v46 = vmul.f32 %v1592_v41, %v105_v45  ;;  %v351_v45 = vld [vmem:[#allocation5 + $0xe8] sm:$0xff] }
 0x1a8   :  { %v110_v47 = vsel %vm109_vm4, %v1592_v41, %v106_v46  ;;  %v389_v46 = vld [vmem:[#allocation5 + $0x170] sm:$0xff]  ;;  %vm1149_vm4 = vcmask 1044480  }
 0x1a9   :  { %v111_v48 = vmul.f32 %v110_v47, %v93_v31  ;;  %v429_v47 = vld [vmem:[#allocation5 + $0x1f0] sm:$0xff] }
 0x1aa   :  { %v228_v22 = vpop.permute.xlu2 %227 }
 0x1ab   :  { %v117_v50 = vmul.f32 %v115_v49, %v111_v48  ;;  %v468_v48 = vld [vmem:[#allocation5 + $0x270] sm:$0xff]  ;;  %v350_v49 = vld [vmem:[#allocation5 + $0xe0] sm:$0xff] }
 0x1ad   :  { %v123_v52 = vadd.f32 %v121_v51, %v117_v50  ;;  %v388_v51 = vld [vmem:[#allocation5 + $0x168] sm:$0xff] }
 0x1af   :  { %1593 = vtanh.f32 %v123_v52  ;;  %v428_v52 = vld [vmem:[#allocation5 + $0x1e8] sm:$0xff] }
 0x1b5   :  { %v1594_v53 = vpop.eup %1593 }
 0x1b6   :  { %125 = vrot.lane.b32.xlu0 %v1594_v53, %s1670_s0  ;;  %1537 = vmatpush.msk.msra.mxu1 %vm88_vm1, %v1594_v53  ;;  %v467_v53 = vld [vmem:[#allocation5 + $0x268] sm:$0xff] }
 0x1b7   :  { %1538 = vmatmul.msk.f32.vlgmr.msra.gmra.mxu1 %vm129_vm5, %v127_v54  ;;  %v387_v54 = vld [vmem:[#allocation5 + $0x160] sm:$0xff] }
 0x1b8   :  { %393 = vmatpush.msrb.mxu1 %v389_v46  ;;  %v455_v46 = vld [vmem:[#allocation5 + $0x208] sm:$0xff] }
 0x1ba   :  { %394 = vmatpush.msrb.mxu1 %v388_v51  ;;  %v507_v51 = vld [vmem:[#allocation5 + $0x2f0] sm:$0xff] }
 0x1bc   :  { %395 = vmatpush.msrb.mxu1 %v387_v54  ;;  %v453_v54 = vld [vmem:[#allocation5 + $0x1f8] sm:$0xff] }
 0x228   :  { %v126_v56 = vpop.permute.xlu0 %125 }
 0x229   :  { %1535 = vmatpush.msk.msra.mxu0 %vm88_vm1, %v126_v56  ;;  %v349_v56 = vld [vmem:[#allocation5 + $0xd8] sm:$0xff] }
 0x22a   :  { %1536 = vmatmul.msk.f32.vlgmr.msra.gmra.mxu0 %vm129_vm5, %v128_v55  ;;  %v427_v55 = vld [vmem:[#allocation5 + $0x1e0] sm:$0xff]  ;;  %vm1151_vm5 = vcmask 1045504  }
 0x22b   :  { %353 = vmatpush.msrb.mxu0 %v352_v44  ;;  %v376_v44 = vld [vmem:[#allocation5 + $0x108] sm:$0xff] }
 0x22d   :  { %354 = vmatpush.msrb.mxu0 %v351_v45  ;;  %v416_v45 = vld [vmem:[#allocation5 + $0x188] sm:$0xff] }
 0x22f   :  { %355 = vmatpush.msrb.mxu0 %v350_v49  ;;  %v415_v49 = vld [vmem:[#allocation5 + $0x180] sm:$0xff] }
 0x231   :  { %356 = vmatpush.msrb.mxu0 %v349_v56  ;;  %v546_v56 = vld [vmem:[#allocation5 + $0x370] sm:$0xff] }
 0x234   :  { %v179_v57 = vpop.f32.mrf.mxu1 }
 0x2a7   :  { %v153_v58 = vpop.f32.mrf.mxu0 }
 0x2a8   :  { %v180_v59 = vadd.f32 %v179_v57, %v153_v58  ;;  %v466_v57 = vld [vmem:[#allocation5 + $0x260] sm:$0xff]  ;;  %v386_v58 = vld [vmem:[#allocation5 + $0x158] sm:$0xff] }
 0x2a9   :  { %396 = vmatpush.msrb.mxu1 %v386_v58  ;;  %v624_v58 = vld [vmem:[#allocation5 + $0x470] sm:$0xff] }
 0x2aa   :  { %v188_v62 = vadd.f32 %v186_v60, %v180_v59  ;;  %v426_v59 = vld [vmem:[#allocation5 + $0x1d8] sm:$0xff]  ;;  %v348_v60 = vld [vmem:[#allocation5 + $0xd0] sm:$0xff] }
 0x2ab   :  { %357 = vmatpush.msrb.mxu0 %v348_v60  ;;  %v545_v60 = vld [vmem:[#allocation5 + $0x368] sm:$0xff] }
 0x2ac   :  { %v194_v63 = vmul.f32 %v1718_v61, %v188_v62 }
 0x2ae   :  { %v196_v0 = vsel %vm195_vm7, %v194_v63, 0.0  ;;  %v385_v63 = vld [vmem:[#allocation5 + $0x150] sm:$0xff] }
 0x2af   :  { %197 = vadd.xlane.f32.xlu0 %v196_v0  ;;  %v425_v0 = vld [vmem:[#allocation5 + $0x1d0] sm:$0xff]  ;;  %397 = vmatpush.msrb.mxu1 %v385_v63  ;;  %v623_v63 = vld [vmem:[#allocation5 + $0x468] sm:$0xff] }
 0x322   :  { %v198_v1 = vpop.xlane.xlu0 %197 }
 0x323   :  { %v199_v2 = vmul.f32 0.01724138, %v198_v1  ;;  %v347_v1 = vld [vmem:[#allocation5 + $0xc8] sm:$0xff] }
 0x324   :  { %358 = vmatpush.msrb.mxu0 %v347_v1  ;;  %v544_v1 = vld [vmem:[#allocation5 + $0x360] sm:$0xff] }
 0x325   :  { %v200_v3 = vsub.f32 %v188_v62, %v199_v2  ;;  %v465_v62 = vld [vmem:[#allocation5 + $0x258] sm:$0xff]  ;;  %v464_v2 = vld [vmem:[#allocation5 + $0x250] sm:$0xff] }
 0x327   :  { %v201_v4 = vmul.f32 %v1718_v61, %v200_v3 }
 0x329   :  { %v202_v5 = vmul.f32 %v201_v4, %v201_v4  ;;  %v424_v4 = vld [vmem:[#allocation5 + $0x1c8] sm:$0xff] }
 0x32b   :  { %v203_v6 = vsel %vm195_vm7, %v202_v5, 0.0  ;;  %v346_v5 = vld [vmem:[#allocation5 + $0xc0] sm:$0xff] }
 0x32c   :  { %204 = vadd.xlane.f32.xlu1 %v203_v6  ;;  %v463_v6 = vld [vmem:[#allocation5 + $0x248] sm:$0xff]  ;;  %359 = vmatpush.msrb.mxu0 %v346_v5  ;;  %v543_v5 = vld [vmem:[#allocation5 + $0x358] sm:$0xff] }
 0x345   :  { %325 = vperm.xlu1 %1587, %v296_v7   ;;  %v383_v7 = vld [vmem:[#allocation5 + $0x140] sm:$0xff] }
 0x39f   :  { %v205_v8 = vpop.xlane.xlu1 %204 }
 0x3a0   :  { %v206_v9 = vmul.f32 0.01724138, %v205_v8  ;;  %v423_v8 = vld [vmem:[#allocation5 + $0x1c0] sm:$0xff] }
 0x3a2   :  { %v207_v10 = vadd.f32 1e-05, %v206_v9  ;;  %v345_v9 = vld [vmem:[#allocation5 + $0xb8] sm:$0xff] }
 0x3a3   :  { %360 = vmatpush.msrb.mxu0 %v345_v9  ;;  %v542_v9 = vld [vmem:[#allocation5 + $0x350] sm:$0xff] }
 0x3a4   :  { %1595 = vrsqrt.f32 %v207_v10  ;;  %vm214_vm9 = vweird.f32 %v207_v10 }
 0x3aa   :  { %v1596_v11 = vpop.eup %1595 }
 0x3ab   :  { %v209_v12 = vmul.f32 %v1596_v11, %v207_v10  ;;  %vm215_vm8 = vweird.f32 %v1596_v11  ;;  %v462_v10 = vld [vmem:[#allocation5 + $0x240] sm:$0xff] }
 0x3ac   :  { %vm216_vm10 = vmor %vm214_vm9, %vm215_vm8 }
 0x3ad   :  { %v210_v13 = vmul.f32 %v1596_v11, %v209_v12  ;;  %v422_v12 = vld [vmem:[#allocation5 + $0x1b8] sm:$0xff] }
 0x3af   :  { %v211_v15 = vmul.f32 0.5, %v210_v13  ;;  %v344_v13 = vld [vmem:[#allocation5 + $0xb0] sm:$0xff] }
 0x3b0   :  { %361 = vmatpush.msrb.mxu0 %v344_v13  ;;  %v541_v13 = vld [vmem:[#allocation5 + $0x348] sm:$0xff] }
 0x3b1   :  { %v212_v16 = vsub.f32 1.5, %v211_v15  ;;  %v381_v15 = vld [vmem:[#allocation5 + $0x130] sm:$0xff] }
 0x3b3   :  { %v213_v17 = vmul.f32 %v1596_v11, %v212_v16  ;;  %v421_v16 = vld [vmem:[#allocation5 + $0x1b0] sm:$0xff] }
 0x3b5   :  { %v217_v19 = vsel %vm216_vm10, %v1596_v11, %v213_v17  ;;  %v382_v11 = vld [vmem:[#allocation5 + $0x138] sm:$0xff]  ;;  %v343_v17 = vld [vmem:[#allocation5 + $0xa8] sm:$0xff] }
 0x3b6   :  { %v218_v20 = vmul.f32 %v217_v19, %v200_v3  ;;  %v384_v3 = vld [vmem:[#allocation5 + $0x148] sm:$0xff]  ;;  %v460_v19 = vld [vmem:[#allocation5 + $0x230] sm:$0xff]  ;;  %362 = vmatpush.msrb.mxu0 %v343_v17  ;;  %v540_v17 = vld [vmem:[#allocation5 + $0x340] sm:$0xff] }
 0x3b7   :  { %398 = vmatpush.msrb.mxu1 %v384_v3  ;;  %v622_v3 = vld [vmem:[#allocation5 + $0x460] sm:$0xff] }
 0x3b8   :  { %v224_v21 = vmul.f32 %v222_v14, %v218_v20  ;;  %v461_v14 = vld [vmem:[#allocation5 + $0x238] sm:$0xff]  ;;  %v297_v20 = vld [vmem:[#allocation5 + $0x70] sm:$0xff] }
 0x3b9   :  { %399 = vmatpush.msrb.mxu1 %v383_v7  ;;  %v621_v7 = vld [vmem:[#allocation5 + $0x458] sm:$0xff] }
 0x3ba   :  { %v230_v23 = vadd.f32 %v228_v22, %v224_v21  ;;  %v1223_v21 = vld [vmem:[#allocation5 + $0x8f0] sm:$0xff]  ;;  %v342_v22 = vld [vmem:[#allocation5 + $0xa0] sm:$0xff] }
 0x3bb   :  { %400 = vmatpush.msrb.mxu1 %v382_v11  ;;  %363 = vmatpush.msrb.mxu0 %v342_v22  ;;  %v620_v11 = vld [vmem:[#allocation5 + $0x450] sm:$0xff]  ;;  %v539_v22 = vld [vmem:[#allocation5 + $0x338] sm:$0xff] }
 0x3bc   :  { %1597 = vtanh.f32 %v230_v23  ;;  %v380_v23 = vld [vmem:[#allocation5 + $0x128] sm:$0xff] }
 0x3bd   :  { %401 = vmatpush.msrb.mxu1 %v381_v15  ;;  %v619_v15 = vld [vmem:[#allocation5 + $0x448] sm:$0xff] }
 0x3bf   :  { %402 = vmatpush.msrb.mxu1 %v380_v23  ;;  %v578_v23 = vld [vmem:[#allocation5 + $0x3b8] sm:$0xff] }
 0x3c2   :  { %v1598_v26 = vpop.eup %1597 }
 0x3c3   :  { %232 = vrot.lane.b32.xlu2 %v1598_v26, %s1671_s26  ;;  %1542 = vmatpush.msk.msra.mxu3 %vm195_vm7, %v1598_v26  ;;  %v420_v26 = vld [vmem:[#allocation5 + $0x1a8] sm:$0xff] }
 0x3c4   :  { %1543 = vmatmul.msk.f32.vlgmr.msra.gmra.mxu3 %vm236_vm11, %v234_v28  ;;  %v341_v28 = vld [vmem:[#allocation5 + $0x98] sm:$0xff] }
 0x3c5   :  { %471 = vmatpush.msrb.mxu3 %v468_v48  ;;  %364 = vmatpush.msrb.mxu0 %v341_v28  ;;  %v375_v48 = vld [vmem:[#allocation5 + $0x100] sm:$0xff]  ;;  %v538_v28 = vld [vmem:[#allocation5 + $0x330] sm:$0xff] }
 0x3c7   :  { %472 = vmatpush.msrb.mxu3 %v467_v53  ;;  %v414_v53 = vld [vmem:[#allocation5 + $0x178] sm:$0xff] }
 0x3c9   :  { %473 = vmatpush.msrb.mxu3 %v466_v57  ;;  %v585_v57 = vld [vmem:[#allocation5 + $0x3f0] sm:$0xff] }
 0x3cb   :  { %292 = vperm.xlu2 %1588, %v289_v27   ;;  %474 = vmatpush.msrb.mxu3 %v465_v62  ;;  %v459_v27 = vld [vmem:[#allocation5 + $0x228] sm:$0xff] }
 0x3cc   :  { %v584_v62 = vld [vmem:[#allocation5 + $0x3e8] sm:$0xff] }
 0x3cd   :  { %475 = vmatpush.msrb.mxu3 %v464_v2  ;;  %v583_v2 = vld [vmem:[#allocation5 + $0x3e0] sm:$0xff] }
 0x3cf   :  { %476 = vmatpush.msrb.mxu3 %v463_v6  ;;  %v582_v6 = vld [vmem:[#allocation5 + $0x3d8] sm:$0xff] }
 0x3d1   :  { %477 = vmatpush.msrb.mxu3 %v462_v10  ;;  %v581_v10 = vld [vmem:[#allocation5 + $0x3d0] sm:$0xff] }
 0x3d3   :  { %478 = vmatpush.msrb.mxu3 %v461_v14  ;;  %v580_v14 = vld [vmem:[#allocation5 + $0x3c8] sm:$0xff] }
 0x3d5   :  { %479 = vmatpush.msrb.mxu3 %v460_v19  ;;  %v579_v19 = vld [vmem:[#allocation5 + $0x3c0] sm:$0xff] }
 0x3d7   :  { %480 = vmatpush.msrb.mxu3 %v459_v27  ;;  %v498_v27 = vld [vmem:[#allocation5 + $0x2a8] sm:$0xff] }
 0x41d   :  { %v233_v30 = vpop.permute.xlu2 %232 }
 0x41e   :  { %1540 = vmatpush.msk.msra.mxu2 %vm195_vm7, %v233_v30  ;;  %v419_v30 = vld [vmem:[#allocation5 + $0x1a0] sm:$0xff] }
 0x41f   :  { %1541 = vmatmul.msk.f32.vlgmr.msra.gmra.mxu2 %vm236_vm11, %v235_v29  ;;  %v379_v29 = vld [vmem:[#allocation5 + $0x120] sm:$0xff] }
 0x420   :  { %432 = vmatpush.msrb.mxu2 %v429_v47  ;;  %403 = vmatpush.msrb.mxu1 %v379_v29  ;;  %v337_v47 = vld [vmem:[#allocation5 + $0x78] sm:$0xff]  ;;  %v577_v29 = vld [vmem:[#allocation5 + $0x3b0] sm:$0xff] }
 0x422   :  { %433 = vmatpush.msrb.mxu2 %v428_v52  ;;  %v374_v52 = vld [vmem:[#allocation5 + $0xf8] sm:$0xff] }
 0x424   :  { %434 = vmatpush.msrb.mxu2 %v427_v55  ;;  %v506_v55 = vld [vmem:[#allocation5 + $0x2e8] sm:$0xff] }
 0x425   :  { %v293_v34 = vpop.permute.xlu2 %292 }
 0x426   :  { %435 = vmatpush.msrb.mxu2 %v426_v59  ;;  %v505_v59 = vld [vmem:[#allocation5 + $0x2e0] sm:$0xff] }
 0x428   :  { %436 = vmatpush.msrb.mxu2 %v425_v0  ;;  %v504_v0 = vld [vmem:[#allocation5 + $0x2d8] sm:$0xff] }
 0x42a   :  { %437 = vmatpush.msrb.mxu2 %v424_v4  ;;  %v503_v4 = vld [vmem:[#allocation5 + $0x2d0] sm:$0xff] }
 0x42c   :  { %438 = vmatpush.msrb.mxu2 %v423_v8  ;;  %v502_v8 = vld [vmem:[#allocation5 + $0x2c8] sm:$0xff] }
 0x42e   :  { %439 = vmatpush.msrb.mxu2 %v422_v12  ;;  %v501_v12 = vld [vmem:[#allocation5 + $0x2c0] sm:$0xff] }
 0x430   :  { %440 = vmatpush.msrb.mxu2 %v421_v16  ;;  %v500_v16 = vld [vmem:[#allocation5 + $0x2b8] sm:$0xff] }
 0x432   :  { %441 = vmatpush.msrb.mxu2 %v420_v26  ;;  %v617_v26 = vld [vmem:[#allocation5 + $0x438] sm:$0xff] }
 0x434   :  { %442 = vmatpush.msrb.mxu2 %v419_v30  ;;  %v616_v30 = vld [vmem:[#allocation5 + $0x430] sm:$0xff] }
 0x447   :  { %v286_v31 = vpop.f32.mrf.mxu3 }
 0x4a2   :  { %v260_v32 = vpop.f32.mrf.mxu2 }
 0x4a3   :  { %v287_v33 = vadd.f32 %v286_v31, %v260_v32  ;;  %v458_v31 = vld [vmem:[#allocation5 + $0x220] sm:$0xff]  ;;  %v340_v32 = vld [vmem:[#allocation5 + $0x90] sm:$0xff] }
 0x4a4   :  { %481 = vmatpush.msrb.mxu3 %v458_v31  ;;  %365 = vmatpush.msrb.mxu0 %v340_v32  ;;  %v497_v31 = vld [vmem:[#allocation5 + $0x2a0] sm:$0xff]  ;;  %v537_v32 = vld [vmem:[#allocation5 + $0x328] sm:$0xff] }
 0x4a5   :  { %v1732_v36 = vadd.f32 %v293_v34, %v287_v33  ;;  %v378_v33 = vld [vmem:[#allocation5 + $0x118] sm:$0xff] }
 0x4a6   :  { %v418_v34 = vld [vmem:[#allocation5 + $0x198] sm:$0xff]  ;;  %404 = vmatpush.msrb.mxu1 %v378_v33 }
 0x4a7   :  { %v301_v37 = vmul.f32 %v1730_v35, %v1732_v36  ;;  %443 = vmatpush.msrb.mxu2 %v418_v34  ;;  %v576_v34 = vld [vmem:[#allocation5 + $0x3a8] sm:$0xff] }
 0x4a9   :  { %302 = vadd.xlane.f32.xlu2 %v301_v37  ;;  %v457_v37 = vld [vmem:[#allocation5 + $0x218] sm:$0xff] }
 0x4aa   :  { %482 = vmatpush.msrb.mxu3 %v457_v37  ;;  %v615_v37 = vld [vmem:[#allocation5 + $0x428] sm:$0xff] }
 0x4c1   :  { %1256 = vperm.xlu2 %1588, %v1230_v38   ;;  %v339_v38 = vld [vmem:[#allocation5 + $0x88] sm:$0xff] }
 0x4c2   :  { %366 = vmatpush.msrb.mxu0 %v339_v38 }
 0x4c9   :  { %1262 = vperm.xlu2 %1588, %v1231_v39   ;;  %v377_v39 = vld [vmem:[#allocation5 + $0x110] sm:$0xff] }
 0x4ca   :  { %405 = vmatpush.msrb.mxu1 %v377_v39  ;;  %v496_v39 = vld [vmem:[#allocation5 + $0x298] sm:$0xff] }
 0x4cc   :  { %406 = vmatpush.msrb.mxu1 %v376_v44 }
 0x4ce   :  { %407 = vmatpush.msrb.mxu1 %v375_v48  ;;  %v613_v48 = vld [vmem:[#allocation5 + $0x418] sm:$0xff] }
 0x4d0   :  { %408 = vmatpush.msrb.mxu1 %v374_v52  ;;  %v612_v52 = vld [vmem:[#allocation5 + $0x410] sm:$0xff] }
 0x4d2   :  { %549 = vmatpush.msra.mxu1 %v546_v56  ;;  %v611_v56 = vld [vmem:[#allocation5 + $0x408] sm:$0xff] }
 0x4d4   :  { %550 = vmatpush.msra.mxu1 %v545_v60  ;;  %v610_v60 = vld [vmem:[#allocation5 + $0x400] sm:$0xff] }
 0x4d6   :  { %551 = vmatpush.msra.mxu1 %v544_v1  ;;  %v570_v1 = vld [vmem:[#allocation5 + $0x378] sm:$0xff] }
 0x4d8   :  { %552 = vmatpush.msra.mxu1 %v543_v5 }
 0x4da   :  { %553 = vmatpush.msra.mxu1 %v542_v9  ;;  %v326_v9 = vpop.permute.xlu1 %325 }
 0x4dc   :  { %554 = vmatpush.msra.mxu1 %v541_v13  ;;  %v656_v13 = vld [vmem:[#allocation5 + $0x4b8] sm:$0xff] }
 0x4de   :  { %555 = vmatpush.msra.mxu1 %v540_v17 }
 0x4e0   :  { %556 = vmatpush.msra.mxu1 %v539_v22 }
 0x4e2   :  { %557 = vmatpush.msra.mxu1 %v538_v28  ;;  %v687_v28 = vld [vmem:[#allocation5 + $0x4f0] sm:$0xff] }
 0x4e4   :  { %558 = vmatpush.msra.mxu1 %v537_v32  ;;  %v686_v32 = vld [vmem:[#allocation5 + $0x4e8] sm:$0xff] }
 0x51c   :  { %v303_v40 = vpop.xlane.xlu2 %302 }
 0x51d   :  { %v304_v41 = vmul.f32 0.02, %v303_v40  ;;  %v417_v40 = vld [vmem:[#allocation5 + $0x190] sm:$0xff] }
 0x51e   :  { %444 = vmatpush.msrb.mxu2 %v417_v40  ;;  %v536_v40 = vld [vmem:[#allocation5 + $0x320] sm:$0xff] }
 0x51f   :  { %v1737_v42 = vsub.f32 %v1732_v36, %v304_v41  ;;  %v456_v41 = vld [vmem:[#allocation5 + $0x210] sm:$0xff]  ;;  %559 = vmatpush.msra.mxu1 %v536_v40  ;;  %v825_v40 = vld [vmem:[#allocation5 + $0x620] sm:$0xff] }
 0x520   :  { %483 = vmatpush.msrb.mxu3 %v456_v41  ;;  %445 = vmatpush.msrb.mxu2 %v416_v45  ;;  %v575_v41 = vld [vmem:[#allocation5 + $0x3a0] sm:$0xff]  ;;  %v495_v45 = vld [vmem:[#allocation5 + $0x290] sm:$0xff] }
 0x521   :  { %v306_v43 = vmul.f32 %v1730_v35, %v1737_v42 }
 0x522   :  { %484 = vmatpush.msrb.mxu3 %v455_v46  ;;  %446 = vmatpush.msrb.mxu2 %v415_v49  ;;  %v535_v46 = vld [vmem:[#allocation5 + $0x318] sm:$0xff]  ;;  %v494_v49 = vld [vmem:[#allocation5 + $0x288] sm:$0xff] }
 0x523   :  { %v307_v50 = vmul.f32 %v306_v43, %v306_v43  ;;  %v338_v43 = vld [vmem:[#allocation5 + $0x80] sm:$0xff]  ;;  %560 = vmatpush.msra.mxu1 %v535_v46  ;;  %v651_v46 = vld [vmem:[#allocation5 + $0x490] sm:$0xff] }
 0x524   :  { %367 = vmatpush.msrb.mxu0 %v338_v43  ;;  %447 = vmatpush.msrb.mxu2 %v414_v53  ;;  %v614_v43 = vld [vmem:[#allocation5 + $0x420] sm:$0xff] }
 0x525   :  { %308 = vadd.xlane.f32.xlu0 %v307_v50  ;;  %v454_v50 = vld [vmem:[#allocation5 + $0x200] sm:$0xff] }
 0x526   :  { %368 = vmatpush.msrb.mxu0 %v337_v47  ;;  %485 = vmatpush.msrb.mxu3 %v454_v50  ;;  %v574_v47 = vld [vmem:[#allocation5 + $0x398] sm:$0xff]  ;;  %v534_v50 = vld [vmem:[#allocation5 + $0x310] sm:$0xff]  ;;  %v493_v53 = vld [vmem:[#allocation5 + $0x280] sm:$0xff] }
 0x527   :  { %588 = vmatpush.msra.mxu2 %v585_v57  ;;  %561 = vmatpush.msra.mxu1 %v534_v50  ;;  %v492_v57 = vld [vmem:[#allocation5 + $0x278] sm:$0xff]  ;;  %v650_v50 = vld [vmem:[#allocation5 + $0x488] sm:$0xff] }
 0x528   :  { %510 = vmatpush.msra.mxu0 %v507_v51  ;;  %486 = vmatpush.msrb.mxu3 %v453_v54  ;;  %v573_v51 = vld [vmem:[#allocation5 + $0x390] sm:$0xff]  ;;  %v533_v54 = vld [vmem:[#allocation5 + $0x308] sm:$0xff] }
 0x529   :  { %589 = vmatpush.msra.mxu2 %v584_v62  ;;  %562 = vmatpush.msra.mxu1 %v533_v54  ;;  %v649_v54 = vld [vmem:[#allocation5 + $0x480] sm:$0xff] }
 0x52a   :  { %511 = vmatpush.msra.mxu0 %v506_v55  ;;  %627 = vmatpush.msra.mxu3 %v624_v58  ;;  %v572_v55 = vld [vmem:[#allocation5 + $0x388] sm:$0xff]  ;;  %v532_v58 = vld [vmem:[#allocation5 + $0x300] sm:$0xff] }
 0x52b   :  { %590 = vmatpush.msra.mxu2 %v583_v2  ;;  %563 = vmatpush.msra.mxu1 %v532_v58  ;;  %v609_v2 = vld [vmem:[#allocation5 + $0x3f8] sm:$0xff] }
 0x52c   :  { %512 = vmatpush.msra.mxu0 %v505_v59  ;;  %628 = vmatpush.msra.mxu3 %v623_v63  ;;  %v571_v59 = vld [vmem:[#allocation5 + $0x380] sm:$0xff]  ;;  %v772_v58 = vld [vmem:[#allocation5 + $0x5b8] sm:$0xff] }
 0x52d   :  { %591 = vmatpush.msra.mxu2 %v582_v6 }
 0x52e   :  { %513 = vmatpush.msra.mxu0 %v504_v0  ;;  %629 = vmatpush.msra.mxu3 %v622_v3  ;;  %v531_v0 = vld [vmem:[#allocation5 + $0x2f8] sm:$0xff] }
 0x52f   :  { %592 = vmatpush.msra.mxu2 %v581_v10  ;;  %564 = vmatpush.msra.mxu1 %v531_v0  ;;  %v771_v0 = vld [vmem:[#allocation5 + $0x5b0] sm:$0xff] }
 0x530   :  { %514 = vmatpush.msra.mxu0 %v503_v4  ;;  %630 = vmatpush.msra.mxu3 %v621_v7 }
 0x531   :  { %593 = vmatpush.msra.mxu2 %v580_v14 }
 0x532   :  { %515 = vmatpush.msra.mxu0 %v502_v8  ;;  %631 = vmatpush.msra.mxu3 %v620_v11 }
 0x533   :  { %594 = vmatpush.msra.mxu2 %v579_v19  ;;  %v688_v19 = vld [vmem:[#allocation5 + $0x4f8] sm:$0xff] }
 0x534   :  { %516 = vmatpush.msra.mxu0 %v501_v12  ;;  %632 = vmatpush.msra.mxu3 %v619_v15 }
 0x535   :  { %595 = vmatpush.msra.mxu2 %v578_v23 }
 0x536   :  { %517 = vmatpush.msra.mxu0 %v500_v16 }
 0x537   :  { %596 = vmatpush.msra.mxu2 %v577_v29  ;;  %v715_v29 = vld [vmem:[#allocation5 + $0x530] sm:$0xff] }
 0x539   :  { %331 = vperm.xlu0 %1586, %v297_v20   ;;  %v618_v20 = vld [vmem:[#allocation5 + $0x440] sm:$0xff]  ;;  %597 = vmatpush.msra.mxu2 %v576_v34  ;;  %v826_v34 = vld [vmem:[#allocation5 + $0x628] sm:$0xff] }
 0x53a   :  { %633 = vmatpush.msra.mxu3 %v618_v20  ;;  %v716_v20 = vld [vmem:[#allocation5 + $0x538] sm:$0xff] }
 0x53b   :  { %598 = vmatpush.msra.mxu2 %v575_v41  ;;  %v652_v41 = vld [vmem:[#allocation5 + $0x498] sm:$0xff] }
 0x53c   :  { %634 = vmatpush.msra.mxu3 %v617_v26 }
 0x53d   :  { %599 = vmatpush.msra.mxu2 %v574_v47  ;;  %v683_v47 = vld [vmem:[#allocation5 + $0x4d0] sm:$0xff] }
 0x53e   :  { %635 = vmatpush.msra.mxu3 %v616_v30  ;;  %v827_v30 = vld [vmem:[#allocation5 + $0x630] sm:$0xff] }
 0x53f   :  { %600 = vmatpush.msra.mxu2 %v573_v51  ;;  %v682_v51 = vld [vmem:[#allocation5 + $0x4c8] sm:$0xff] }
 0x540   :  { %636 = vmatpush.msra.mxu3 %v615_v37  ;;  %v653_v37 = vld [vmem:[#allocation5 + $0x4a0] sm:$0xff] }
 0x541   :  { %1226 = vperm.xlu0 %1586, %v1223_v21   ;;  %v499_v21 = vld [vmem:[#allocation5 + $0x2b0] sm:$0xff]  ;;  %601 = vmatpush.msra.mxu2 %v572_v55  ;;  %v681_v55 = vld [vmem:[#allocation5 + $0x4c0] sm:$0xff] }
 0x542   :  { %518 = vmatpush.msra.mxu0 %v499_v21  ;;  %637 = vmatpush.msra.mxu3 %v614_v43  ;;  %v828_v21 = vld [vmem:[#allocation5 + $0x638] sm:$0xff] }
 0x543   :  { %602 = vmatpush.msra.mxu2 %v571_v59  ;;  %v684_v43 = vld [vmem:[#allocation5 + $0x4d8] sm:$0xff] }
 0x544   :  { %519 = vmatpush.msra.mxu0 %v498_v27  ;;  %638 = vmatpush.msra.mxu3 %v613_v48  ;;  %v655_v27 = vld [vmem:[#allocation5 + $0x4b0] sm:$0xff]  ;;  %v800_v59 = vld [vmem:[#allocation5 + $0x5f8] sm:$0xff] }
 0x545   :  { %603 = vmatpush.msra.mxu2 %v570_v1  ;;  %v711_v48 = vld [vmem:[#allocation5 + $0x510] sm:$0xff] }
 0x546   :  { %520 = vmatpush.msra.mxu0 %v497_v31  ;;  %639 = vmatpush.msra.mxu3 %v612_v52  ;;  %v654_v31 = vld [vmem:[#allocation5 + $0x4a8] sm:$0xff]  ;;  %v799_v1 = vld [vmem:[#allocation5 + $0x5f0] sm:$0xff] }
 0x547   :  { %v710_v52 = vld [vmem:[#allocation5 + $0x508] sm:$0xff] }
 0x548   :  { %521 = vmatpush.msra.mxu0 %v496_v39  ;;  %640 = vmatpush.msra.mxu3 %v611_v56  ;;  %v713_v39 = vld [vmem:[#allocation5 + $0x520] sm:$0xff] }
 0x549   :  { %v709_v56 = vld [vmem:[#allocation5 + $0x500] sm:$0xff] }
 0x54a   :  { %522 = vmatpush.msra.mxu0 %v495_v45  ;;  %641 = vmatpush.msra.mxu3 %v610_v60  ;;  %v824_v45 = vld [vmem:[#allocation5 + $0x618] sm:$0xff]  ;;  %v821_v60 = vld [vmem:[#allocation5 + $0x600] sm:$0xff] }
 0x54c   :  { %523 = vmatpush.msra.mxu0 %v494_v49  ;;  %642 = vmatpush.msra.mxu3 %v609_v2  ;;  %v823_v49 = vld [vmem:[#allocation5 + $0x610] sm:$0xff] }
 0x54d   :  { %v939_v2 = vld [vmem:[#allocation5 + $0x730] sm:$0xff] }
 0x54e   :  { %524 = vmatpush.msra.mxu0 %v493_v53  ;;  %v822_v53 = vld [vmem:[#allocation5 + $0x608] sm:$0xff] }
 0x550   :  { %525 = vmatpush.msra.mxu0 %v492_v57  ;;  %v744_v57 = vld [vmem:[#allocation5 + $0x578] sm:$0xff] }
 0x598   :  { %v309_v33 = vpop.xlane.xlu0 %308 }
 0x599   :  { %v310_v38 = vmul.f32 0.02, %v309_v33  ;;  %v714_v33 = vld [vmem:[#allocation5 + $0x528] sm:$0xff] }
 0x59b   :  { %v311_v44 = vadd.f32 1e-05, %v310_v38  ;;  %v685_v38 = vld [vmem:[#allocation5 + $0x4e0] sm:$0xff] }
 0x59d   :  { %1599 = vrsqrt.f32 %v311_v44  ;;  %vm318_vm14 = vweird.f32 %v311_v44 }
 0x5a3   :  { %v1600_v62 = vpop.eup %1599 }
 0x5a4   :  { %v313_v63 = vmul.f32 %v1600_v62, %v311_v44  ;;  %vm319_vm13 = vweird.f32 %v1600_v62  ;;  %v712_v44 = vld [vmem:[#allocation5 + $0x518] sm:$0xff] }
 0x5a5   :  { %vm320_vm15 = vmor %vm318_vm14, %vm319_vm13 }
 0x5a6   :  { %v314_v3 = vmul.f32 %v1600_v62, %v313_v63  ;;  %v743_v63 = vld [vmem:[#allocation5 + $0x570] sm:$0xff] }
 0x5a8   :  { %v315_v4 = vmul.f32 0.5, %v314_v3  ;;  %v742_v3 = vld [vmem:[#allocation5 + $0x568] sm:$0xff] }
 0x5aa   :  { %v316_v5 = vsub.f32 1.5, %v315_v4  ;;  %v770_v4 = vld [vmem:[#allocation5 + $0x5a8] sm:$0xff] }
 0x5ab   :  { %v332_v11 = vpop.permute.xlu0 %331 }
 0x5ac   :  { %v317_v6 = vmul.f32 %v1600_v62, %v316_v5  ;;  %v798_v5 = vld [vmem:[#allocation5 + $0x5e8] sm:$0xff] }
 0x5ae   :  { %v321_v7 = vsel %vm320_vm15, %v1600_v62, %v317_v6  ;;  %v940_v62 = vld [vmem:[#allocation5 + $0x738] sm:$0xff]  ;;  %v938_v6 = vld [vmem:[#allocation5 + $0x728] sm:$0xff] }
 0x5af   :  { %v322_v8 = vmul.f32 %v321_v7, %v1737_v42  ;;  %v741_v7 = vld [vmem:[#allocation5 + $0x560] sm:$0xff] }
 0x5b1   :  { %v328_v10 = vmul.f32 %v326_v9, %v322_v8  ;;  %v769_v8 = vld [vmem:[#allocation5 + $0x5a0] sm:$0xff] }
 0x5b2   :  { %v797_v9 = vld [vmem:[#allocation5 + $0x5e0] sm:$0xff] }
 0x5b3   :  { %v334_v12 = vadd.f32 %v332_v11, %v328_v10  ;;  %v937_v10 = vld [vmem:[#allocation5 + $0x720] sm:$0xff]  ;;  %v740_v11 = vld [vmem:[#allocation5 + $0x558] sm:$0xff] }
 0x5b5   :  { %1601 = vtanh.f32 %v334_v12  ;;  %v768_v12 = vld [vmem:[#allocation5 + $0x598] sm:$0xff] }
 0x5bb   :  { %v1602_v14 = vpop.eup %1601 }
 0x5bc   :  { %369 = vmatmul.f32.vlgmr.msrb.gmra.mxu0 %v1602_v14  ;;  %v391_v15 = vrot.slane %v1602_v14, 1  ;;  %v430_v16 = vrot.slane %v1602_v14, 2  ;;  %v469_v17 = vrot.slane %v1602_v14, 3  ;;  %v508_v42 = vrot.slane %v1602_v14, 4 }
 0x5bd   :  { %669 = vmatpush.msrb.mxu0 %v656_v13  ;;  %v547_v22 = vrot.slane %v1602_v14, 5  ;;  %v586_v23 = vrot.slane %v1602_v14, 6  ;;  %v625_v26 = vrot.slane %v1602_v14, 7  ;;  %v796_v13 = vld [vmem:[#allocation5 + $0x5d8] sm:$0xff] }
 0x5be   :  { %409 = vmatmul.f32.vlgmr.msrb.gmra.mxu1 %v391_v15  ;;  %448 = vmatmul.f32.vlgmr.msrb.gmra.mxu2 %v430_v16  ;;  %v936_v14 = vld [vmem:[#allocation5 + $0x718] sm:$0xff]  ;;  %v739_v15 = vld [vmem:[#allocation5 + $0x550] sm:$0xff] }
 0x5bf   :  { %487 = vmatmul.f32.vlgmr.msrb.gmra.mxu3 %v469_v17  ;;  %697 = vmatpush.msrb.mxu1 %v688_v19  ;;  %v767_v16 = vld [vmem:[#allocation5 + $0x590] sm:$0xff] }
 0x5c0   :  { %725 = vmatpush.msrb.mxu3 %v716_v20  ;;  %837 = vmatpush.msrb.mxu2 %v828_v21  ;;  %v795_v17 = vld [vmem:[#allocation5 + $0x5d0] sm:$0xff]  ;;  %v738_v20 = vld [vmem:[#allocation5 + $0x548] sm:$0xff] }
 0x5c1   :  { %670 = vmatpush.msrb.mxu0 %v655_v27  ;;  %698 = vmatpush.msrb.mxu1 %v687_v28  ;;  %v935_v19 = vld [vmem:[#allocation5 + $0x710] sm:$0xff]  ;;  %v766_v21 = vld [vmem:[#allocation5 + $0x588] sm:$0xff]  ;;  %v793_v27 = vld [vmem:[#allocation5 + $0x5c0] sm:$0xff] }
 0x5c2   :  { %726 = vmatpush.msrb.mxu3 %v715_v29  ;;  %838 = vmatpush.msrb.mxu2 %v827_v30  ;;  %v933_v28 = vld [vmem:[#allocation5 + $0x700] sm:$0xff]  ;;  %v336_v29 = vld [vmem:[#allocation5 + $0x478] sm:$0x1] }
 0x5c3   :  { %671 = vmatpush.msrb.mxu0 %v654_v31  ;;  %699 = vmatpush.msrb.mxu1 %v686_v32 }
 0x5c4   :  { %526 = vmatmul.f32.vlgmr.msra.gmra.mxu0 %v508_v42  ;;  %727 = vmatpush.msrb.mxu3 %v714_v33  ;;  %v794_v42 = vld [vmem:[#allocation5 + $0x5c8] sm:$0xff] }
 0x5c5   :  { %839 = vmatpush.msrb.mxu2 %v826_v34  ;;  %672 = vmatpush.msrb.mxu0 %v653_v37 }
 0x5c6   :  { %565 = vmatmul.f32.vlgmr.msra.gmra.mxu1 %v547_v22  ;;  %604 = vmatmul.f32.vlgmr.msra.gmra.mxu2 %v586_v23  ;;  %v765_v22 = vld [vmem:[#allocation5 + $0x580] sm:$0xff]  ;;  %v934_v23 = vld [vmem:[#allocation5 + $0x708] sm:$0xff] }
 0x5c7   :  { %643 = vmatmul.f32.vlgmr.msra.gmra.mxu3 %v625_v26  ;;  %700 = vmatpush.msrb.mxu1 %v685_v38  ;;  %v737_v26 = vld [vmem:[#allocation5 + $0x540] sm:$0xff] }
 0x5c8   :  { %728 = vmatpush.msrb.mxu3 %v713_v39  ;;  %840 = vmatpush.msrb.mxu2 %v825_v40 }
 0x5c9   :  { %673 = vmatpush.msrb.mxu0 %v652_v41  ;;  %701 = vmatpush.msrb.mxu1 %v684_v43 }
 0x5ca   :  { %729 = vmatpush.msrb.mxu3 %v712_v44  ;;  %841 = vmatpush.msrb.mxu2 %v824_v45 }
 0x5cb   :  { %674 = vmatpush.msrb.mxu0 %v651_v46  ;;  %702 = vmatpush.msrb.mxu1 %v683_v47 }
 0x5cc   :  { %730 = vmatpush.msrb.mxu3 %v711_v48  ;;  %842 = vmatpush.msrb.mxu2 %v823_v49 }
 0x5cd   :  { %675 = vmatpush.msrb.mxu0 %v650_v50  ;;  %703 = vmatpush.msrb.mxu1 %v682_v51  ;;  %v856_v50 = vld [vmem:[#allocation5 + $0x678] sm:$0xff] }
 0x5ce   :  { %731 = vmatpush.msrb.mxu3 %v710_v52  ;;  %843 = vmatpush.msrb.mxu2 %v822_v53  ;;  %v884_v51 = vld [vmem:[#allocation5 + $0x6b8] sm:$0xff] }
 0x5cf   :  { %676 = vmatpush.msrb.mxu0 %v649_v54  ;;  %704 = vmatpush.msrb.mxu1 %v681_v55  ;;  %v912_v52 = vld [vmem:[#allocation5 + $0x6f8] sm:$0xff]  ;;  %v855_v54 = vld [vmem:[#allocation5 + $0x670] sm:$0xff] }
 0x5d0   :  { %732 = vmatpush.msrb.mxu3 %v709_v56  ;;  %844 = vmatpush.msrb.mxu2 %v821_v60  ;;  %v1052_v53 = vld [vmem:[#allocation5 + $0x838] sm:$0xff]  ;;  %v883_v55 = vld [vmem:[#allocation5 + $0x6b0] sm:$0xff]  ;;  %v910_v60 = vld [vmem:[#allocation5 + $0x6e8] sm:$0xff] }
 0x5d1   :  { %781 = vmatpush.msra.mxu0 %v772_v58  ;;  %809 = vmatpush.msra.mxu1 %v800_v59  ;;  %v911_v56 = vld [vmem:[#allocation5 + $0x6f0] sm:$0xff]  ;;  %v854_v58 = vld [vmem:[#allocation5 + $0x668] sm:$0xff] }
 0x5d2   :  { %753 = vmatpush.msra.mxu3 %v744_v57  ;;  %949 = vmatpush.msra.mxu2 %v940_v62  ;;  %v1051_v57 = vld [vmem:[#allocation5 + $0x830] sm:$0xff]  ;;  %v882_v59 = vld [vmem:[#allocation5 + $0x6a8] sm:$0xff] }
 0x5d3   :  { %782 = vmatpush.msra.mxu0 %v771_v0  ;;  %810 = vmatpush.msra.mxu1 %v799_v1  ;;  %v1050_v62 = vld [vmem:[#allocation5 + $0x828] sm:$0xff]  ;;  %v881_v0 = vld [vmem:[#allocation5 + $0x6a0] sm:$0xff] }
 0x5d4   :  { %754 = vmatpush.msra.mxu3 %v743_v63  ;;  %950 = vmatpush.msra.mxu2 %v939_v2  ;;  %v853_v63 = vld [vmem:[#allocation5 + $0x660] sm:$0xff] }
 0x5d5   :  { %783 = vmatpush.msra.mxu0 %v770_v4  ;;  %811 = vmatpush.msra.mxu1 %v798_v5  ;;  %v909_v1 = vld [vmem:[#allocation5 + $0x6e0] sm:$0xff]  ;;  %v880_v4 = vld [vmem:[#allocation5 + $0x698] sm:$0xff] }
 0x5d6   :  { %755 = vmatpush.msra.mxu3 %v742_v3  ;;  %951 = vmatpush.msra.mxu2 %v938_v6  ;;  %v1049_v2 = vld [vmem:[#allocation5 + $0x820] sm:$0xff]  ;;  %v852_v3 = vld [vmem:[#allocation5 + $0x658] sm:$0xff]  ;;  %v851_v6 = vld [vmem:[#allocation5 + $0x650] sm:$0xff] }
 0x5d7   :  { %784 = vmatpush.msra.mxu0 %v769_v8  ;;  %812 = vmatpush.msra.mxu1 %v797_v9  ;;  %v908_v5 = vld [vmem:[#allocation5 + $0x6d8] sm:$0xff]  ;;  %v879_v8 = vld [vmem:[#allocation5 + $0x690] sm:$0xff] }
 0x5d8   :  { %756 = vmatpush.msra.mxu3 %v741_v7  ;;  %952 = vmatpush.msra.mxu2 %v937_v10  ;;  %v1048_v7 = vld [vmem:[#allocation5 + $0x818] sm:$0xff]  ;;  %v907_v9 = vld [vmem:[#allocation5 + $0x6d0] sm:$0xff]  ;;  %v850_v10 = vld [vmem:[#allocation5 + $0x648] sm:$0xff] }
 0x5d9   :  { %785 = vmatpush.msra.mxu0 %v768_v12  ;;  %813 = vmatpush.msra.mxu1 %v796_v13  ;;  %v878_v12 = vld [vmem:[#allocation5 + $0x688] sm:$0xff] }
 0x5da   :  { %757 = vmatpush.msra.mxu3 %v740_v11  ;;  %953 = vmatpush.msra.mxu2 %v936_v14  ;;  %v1047_v11 = vld [vmem:[#allocation5 + $0x810] sm:$0xff]  ;;  %v906_v13 = vld [vmem:[#allocation5 + $0x6c8] sm:$0xff]  ;;  %v849_v14 = vld [vmem:[#allocation5 + $0x640] sm:$0xff] }
 0x5db   :  { %786 = vmatpush.msra.mxu0 %v767_v16  ;;  %814 = vmatpush.msra.mxu1 %v795_v17  ;;  %v877_v16 = vld [vmem:[#allocation5 + $0x680] sm:$0xff] }
 0x5dc   :  { %758 = vmatpush.msra.mxu3 %v739_v15  ;;  %954 = vmatpush.msra.mxu2 %v935_v19  ;;  %v1046_v15 = vld [vmem:[#allocation5 + $0x808] sm:$0xff]  ;;  %v905_v17 = vld [vmem:[#allocation5 + $0x6c0] sm:$0xff]  ;;  %v968_v19 = vld [vmem:[#allocation5 + $0x778] sm:$0xff] }
 0x5dd   :  { %787 = vmatpush.msra.mxu0 %v766_v21  ;;  %815 = vmatpush.msra.mxu1 %v794_v42  ;;  %v1024_v21 = vld [vmem:[#allocation5 + $0x7f8] sm:$0xff]  ;;  %v1045_v42 = vld [vmem:[#allocation5 + $0x800] sm:$0xff] }
 0x5de   :  { %759 = vmatpush.msra.mxu3 %v738_v20  ;;  %955 = vmatpush.msra.mxu2 %v934_v23  ;;  %v996_v20 = vld [vmem:[#allocation5 + $0x7b8] sm:$0xff]  ;;  %v995_v23 = vld [vmem:[#allocation5 + $0x7b0] sm:$0xff] }
 0x5df   :  { %788 = vmatpush.msra.mxu0 %v765_v22  ;;  %816 = vmatpush.msra.mxu1 %v793_v27  ;;  %v967_v22 = vld [vmem:[#allocation5 + $0x770] sm:$0xff]  ;;  %v966_v27 = vld [vmem:[#allocation5 + $0x768] sm:$0xff] }
 0x5e0   :  { %760 = vmatpush.msra.mxu3 %v737_v26  ;;  %956 = vmatpush.msra.mxu2 %v933_v28  ;;  %v1023_v26 = vld [vmem:[#allocation5 + $0x7f0] sm:$0xff]  ;;  %v994_v28 = vld [vmem:[#allocation5 + $0x7a8] sm:$0xff] }
 0x639   :  { %v370_v30 = vpop.f32.mrf.mxu0 }
 0x63a   :  { %v373_v31 = vadd.f32 %v370_v30, %v336_v29  ;;  %v1022_v29 = vld [vmem:[#allocation5 + $0x7e8] sm:$0xff]  ;;  %v965_v30 = vld [vmem:[#allocation5 + $0x760] sm:$0xff] }
 0x63b   :  { %v410_v32 = vpop.f32.mrf.mxu1 }
 0x63c   :  { %v413_v33 = vadd.f32 %v410_v32, %v373_v31  ;;  %v993_v31 = vld [vmem:[#allocation5 + $0x7a0] sm:$0xff] }
 0x63d   :  { %v1021_v32 = vld [vmem:[#allocation5 + $0x7e0] sm:$0xff] }
 0x641   :  { %v449_v34 = vpop.f32.mrf.mxu2  ;;  %v527_v40 = vpop.f32.mrf.mxu0 }
 0x642   :  { %v452_v37 = vadd.f32 %v449_v34, %v413_v33  ;;  %v488_v38 = vpop.f32.mrf.mxu3  ;;  %v964_v33 = vld [vmem:[#allocation5 + $0x758] sm:$0xff] }
 0x643   :  { %v566_v43 = vpop.f32.mrf.mxu1  ;;  %v992_v34 = vld [vmem:[#allocation5 + $0x798] sm:$0xff] }
 0x644   :  { %v491_v39 = vadd.f32 %v488_v38, %v452_v37  ;;  %v1020_v37 = vld [vmem:[#allocation5 + $0x7d8] sm:$0xff]  ;;  %v963_v38 = vld [vmem:[#allocation5 + $0x750] sm:$0xff] }
 0x646   :  { %v530_v41 = vadd.f32 %v527_v40, %v491_v39  ;;  %v991_v39 = vld [vmem:[#allocation5 + $0x790] sm:$0xff] }
 0x647   :  { %v1019_v40 = vld [vmem:[#allocation5 + $0x7d0] sm:$0xff] }
 0x648   :  { %v569_v44 = vadd.f32 %v566_v43, %v530_v41  ;;  %v962_v41 = vld [vmem:[#allocation5 + $0x748] sm:$0xff] }
 0x649   :  { %v605_v45 = vpop.f32.mrf.mxu2  ;;  %v990_v43 = vld [vmem:[#allocation5 + $0x788] sm:$0xff] }
 0x64a   :  { %v608_v46 = vadd.f32 %v605_v45, %v569_v44  ;;  %v644_v47 = vpop.f32.mrf.mxu3  ;;  %v1018_v44 = vld [vmem:[#allocation5 + $0x7c8] sm:$0xff]  ;;  %v961_v45 = vld [vmem:[#allocation5 + $0x740] sm:$0xff] }
 0x64c   :  { %v647_v48 = vadd.f32 %v644_v47, %v608_v46  ;;  %v989_v46 = vld [vmem:[#allocation5 + $0x780] sm:$0xff] }
 0x64d   :  { %v1017_v47 = vld [vmem:[#allocation5 + $0x7c0] sm:$0xff] }
 0x64e   :  { %1603 = vtanh.f32 %v647_v48  ;;  %v1080_v48 = vld [vmem:[#allocation5 + $0x878] sm:$0xff] }
 0x654   :  { %v1742_v49 = vpop.eup %1603 }
 0x655   :  { %1545 = vmatmul.msk.f32.vlgmr.msrb.gmra.mxu0 %vm657_vm0, %v1742_v49  ;;  %1546 = vmatmul.msk.f32.vlgmr.msrb.gmra.mxu1 %vm657_vm0, %v1742_v49 }
 0x656   :  { %1547 = vmatmul.msk.f32.vlgmr.msrb.gmra.mxu3 %vm657_vm0, %v1742_v49  ;;  %1551 = vmatmul.msk.f32.vlgmr.msrb.gmra.mxu2 %vm657_vm0, %v1742_v49 }
 0x657   :  { %865 = vmatpush.msrb.mxu3 %v856_v50  ;;  %893 = vmatpush.msrb.mxu0 %v884_v51  ;;  %v1079_v50 = vld [vmem:[#allocation5 + $0x870] sm:$0xff]  ;;  %v1078_v51 = vld [vmem:[#allocation5 + $0x868] sm:$0xff] }
 0x658   :  { %921 = vmatpush.msrb.mxu1 %v912_v52  ;;  %1061 = vmatpush.msrb.mxu2 %v1052_v53  ;;  %v1077_v52 = vld [vmem:[#allocation5 + $0x860] sm:$0xff]  ;;  %v1076_v53 = vld [vmem:[#allocation5 + $0x858] sm:$0xff] }
 0x659   :  { %866 = vmatpush.msrb.mxu3 %v855_v54  ;;  %894 = vmatpush.msrb.mxu0 %v883_v55  ;;  %v1075_v54 = vld [vmem:[#allocation5 + $0x850] sm:$0xff]  ;;  %v1074_v55 = vld [vmem:[#allocation5 + $0x848] sm:$0xff] }
 0x65a   :  { %922 = vmatpush.msrb.mxu1 %v911_v56  ;;  %1062 = vmatpush.msrb.mxu2 %v1051_v57  ;;  %v1073_v56 = vld [vmem:[#allocation5 + $0x840] sm:$0xff] }
 0x65b   :  { %867 = vmatpush.msrb.mxu3 %v854_v58  ;;  %895 = vmatpush.msrb.mxu0 %v882_v59 }
 0x65c   :  { %923 = vmatpush.msrb.mxu1 %v910_v60  ;;  %1063 = vmatpush.msrb.mxu2 %v1050_v62 }
 0x65d   :  { %868 = vmatpush.msrb.mxu3 %v853_v63  ;;  %896 = vmatpush.msrb.mxu0 %v881_v0 }
 0x65e   :  { %924 = vmatpush.msrb.mxu1 %v909_v1  ;;  %1064 = vmatpush.msrb.mxu2 %v1049_v2 }
 0x65f   :  { %1548 = vmatmul.msk.f32.vlgmr.msra.gmra.mxu3 %vm657_vm0, %v1742_v49  ;;  %1549 = vmatmul.msk.f32.vlgmr.msra.gmra.mxu0 %vm657_vm0, %v1742_v49 }
 0x660   :  { %1550 = vmatmul.msk.f32.vlgmr.msra.gmra.mxu1 %vm657_vm0, %v1742_v49  ;;  %869 = vmatpush.msrb.mxu3 %v852_v3 }
 0x661   :  { %897 = vmatpush.msrb.mxu0 %v880_v4  ;;  %925 = vmatpush.msrb.mxu1 %v908_v5 }
 0x662   :  { %1555 = vmatmul.msk.f32.vlgmr.msra.gmra.mxu2 %vm657_vm0, %v1742_v49  ;;  %870 = vmatpush.msrb.mxu3 %v851_v6 }
 0x663   :  { %1065 = vmatpush.msrb.mxu2 %v1048_v7  ;;  %898 = vmatpush.msrb.mxu0 %v879_v8 }
 0x664   :  { %926 = vmatpush.msrb.mxu1 %v907_v9  ;;  %871 = vmatpush.msrb.mxu3 %v850_v10 }
 0x665   :  { %1066 = vmatpush.msrb.mxu2 %v1047_v11  ;;  %899 = vmatpush.msrb.mxu0 %v878_v12 }
 0x666   :  { %927 = vmatpush.msrb.mxu1 %v906_v13  ;;  %872 = vmatpush.msrb.mxu3 %v849_v14 }
 0x667   :  { %1067 = vmatpush.msrb.mxu2 %v1046_v15  ;;  %900 = vmatpush.msrb.mxu0 %v877_v16 }
 0x668   :  { %928 = vmatpush.msrb.mxu1 %v905_v17  ;;  %977 = vmatpush.msra.mxu3 %v968_v19 }
 0x669   :  { %1005 = vmatpush.msra.mxu0 %v996_v20  ;;  %1068 = vmatpush.msrb.mxu2 %v1045_v42 }
 0x66a   :  { %1033 = vmatpush.msra.mxu1 %v1024_v21  ;;  %1552 = vmatmul.msk.f32.vlgmr.msrb.gmra.mxu3 %vm657_vm0, %v1742_v49 }
 0x66b   :  { %1553 = vmatmul.msk.f32.vlgmr.msrb.gmra.mxu0 %vm657_vm0, %v1742_v49  ;;  %1554 = vmatmul.msk.f32.vlgmr.msrb.gmra.mxu1 %vm657_vm0, %v1742_v49 }
 0x66c   :  { %1559 = vmatmul.msk.f32.vlgmr.msrb.gmra.mxu2 %vm657_vm0, %v1742_v49  ;;  %978 = vmatpush.msra.mxu3 %v967_v22 }
 0x66d   :  { %1006 = vmatpush.msra.mxu0 %v995_v23  ;;  %1034 = vmatpush.msra.mxu1 %v1023_v26 }
 0x66e   :  { %979 = vmatpush.msra.mxu3 %v966_v27 }
 0x66f   :  { %1007 = vmatpush.msra.mxu0 %v994_v28  ;;  %1035 = vmatpush.msra.mxu1 %v1022_v29 }
 0x670   :  { %980 = vmatpush.msra.mxu3 %v965_v30 }
 0x671   :  { %1008 = vmatpush.msra.mxu0 %v993_v31  ;;  %1036 = vmatpush.msra.mxu1 %v1021_v32  ;;  %v1162_v31 = vld [vmem:[#allocation5 + $0x880] sm:$0xff] }
 0x672   :  { %981 = vmatpush.msra.mxu3 %v964_v33 }
 0x673   :  { %1009 = vmatpush.msra.mxu0 %v992_v34  ;;  %1037 = vmatpush.msra.mxu1 %v1020_v37 }
 0x674   :  { %982 = vmatpush.msra.mxu3 %v963_v38 }
 0x675   :  { %1010 = vmatpush.msra.mxu0 %v991_v39  ;;  %1038 = vmatpush.msra.mxu1 %v1019_v40 }
 0x676   :  { %983 = vmatpush.msra.mxu3 %v962_v41  ;;  %v1163_v41 = vld [vmem:[#allocation5 + $0x888] sm:$0xff] }
 0x677   :  { %1011 = vmatpush.msra.mxu0 %v990_v43  ;;  %1039 = vmatpush.msra.mxu1 %v1018_v44 }
 0x678   :  { %984 = vmatpush.msra.mxu3 %v961_v45 }
 0x679   :  { %1012 = vmatpush.msra.mxu0 %v989_v46  ;;  %1040 = vmatpush.msra.mxu1 %v1017_v47 }
 0x67a   :  { %1556 = vmatmul.msk.f32.vlgmr.msra.gmra.mxu3 %vm657_vm0, %v1742_v49  ;;  %1557 = vmatmul.msk.f32.vlgmr.msra.gmra.mxu0 %vm657_vm0, %v1742_v49 }
 0x67b   :  { %1558 = vmatmul.msk.f32.vlgmr.msra.gmra.mxu1 %vm657_vm0, %v1742_v49  ;;  %1089 = vmatpush.msrb.mxu3 %v1080_v48 }
 0x67d   :  { %1090 = vmatpush.msrb.mxu3 %v1079_v50 }
 0x67f   :  { %1091 = vmatpush.msrb.mxu3 %v1078_v51 }
 0x681   :  { %1092 = vmatpush.msrb.mxu3 %v1077_v52 }
 0x683   :  { %1093 = vmatpush.msrb.mxu3 %v1076_v53  ;;  %v1173_v53 = vld [vmem:[#allocation5 + $0x8e8] sm:$0xff] }
 0x685   :  { %1094 = vmatpush.msrb.mxu3 %v1075_v54  ;;  %v1172_v54 = vld [vmem:[#allocation5 + $0x8e0] sm:$0xff] }
 0x687   :  { %1095 = vmatpush.msrb.mxu3 %v1074_v55 }
 0x689   :  { %1096 = vmatpush.msrb.mxu3 %v1073_v56 }
 0x68a   :  { %1560 = vmatmul.msk.f32.vlgmr.msrb.gmra.mxu3 %vm657_vm0, %v1742_v49 }
 0x6d2   :  { %v706_v58 = vpop.f32.mrf.mxu1  ;;  %v678_v59 = vpop.f32.mrf.mxu0 }
 0x6d3   :  { %v1102_v2 = vrot.slane %v706_v58, 7  ;;  %v1227_v58 = vpop.permute.xlu0 %1226 }
 0x6d5   :  { %v1144_v7 = vsel %vm1143_vm2, %v678_v59, %v1102_v2 }
 0x6d9   :  { %v734_v57 = vpop.f32.mrf.mxu3  ;;  %v846_v0 = vpop.f32.mrf.mxu2 }
 0x6da   :  { %v1105_v3 = vrot.slane %v734_v57, 6  ;;  %v1117_v23 = vrot.slane %v846_v0, 2 }
 0x6dc   :  { %v790_v63 = vpop.f32.mrf.mxu0  ;;  %v1145_v49 = vsel %vm88_vm1, %v1144_v7, %v1105_v3 }
 0x6dd   :  { %v818_v62 = vpop.f32.mrf.mxu1  ;;  %v1111_v12 = vrot.slane %v790_v63, 4  ;;  %v1419_v63 = vld [vmem:[#allocation5 + $0x8a0] sm:$0x3] }
 0x6de   :  { %v1114_v17 = vrot.slane %v818_v62, 3  ;;  %v1327_v62 = vld [vmem:[#allocation5 + $0x8d8] sm:$0xf] }
 0x6e2   :  { %v762_v60 = vpop.f32.mrf.mxu3 }
 0x6e3   :  { %v1108_v5 = vrot.slane %v762_v60, 5 }
 0x6e5   :  { %v1147_v10 = vsel %vm1146_vm3, %v1145_v49, %v1108_v5  ;;  %v958_v11 = vpop.f32.mrf.mxu2 }
 0x6e6   :  { %v1148_v15 = vsel %vm195_vm7, %v1147_v10, %v1111_v12  ;;  %v1126_v16 = vrot.slane %v958_v11, 6  ;;  %v1257_v10 = vpop.permute.xlu2 %1256 }
 0x6e7   :  { %v1150_v42 = vsel %vm1149_vm4, %v1148_v15, %v1114_v17 }
 0x6e8   :  { %v930_v4 = vpop.f32.mrf.mxu1  ;;  %v902_v6 = vpop.f32.mrf.mxu0  ;;  %v1152_v28 = vsel %vm1151_vm5, %v1150_v42, %v1117_v23  ;;  %v1269_v42 = vld [vmem:[#allocation5 + $0x8c0] sm:$0xf] }
 0x6e9   :  { %v1123_v8 = vrot.slane %v930_v4, 7 }
 0x6eb   :  { %v1155_v13 = vsel %vm1143_vm2, %v902_v6, %v1123_v8 }
 0x6ec   :  { %v1156_v20 = vsel %vm88_vm1, %v1155_v13, %v1126_v16  ;;  %vm1174_vm1 = vcmask 130048  }
 0x6ed   :  { %v874_v1 = vpop.f32.mrf.mxu3 }
 0x6ee   :  { %v1120_v21 = vrot.slane %v874_v1, 1  ;;  %v1263_v17 = vpop.permute.xlu2 %1262 }
 0x6ef   :  { %v1070_v32 = vpop.f32.mrf.mxu2 }
 0x6f0   :  { %v1154_v30 = vsel %vm1153_vm6, %v1152_v28, %v1120_v21  ;;  %v1138_v38 = vrot.slane %v1070_v32, 2 }
 0x6f1   :  { %v1164_v37 = vadd.f32 %v1162_v31, %v1154_v30 }
 0x6f3   :  { %1605 = vtanh.f32 %v1164_v37 }
 0x6f7   :  { %v1014_v19 = vpop.f32.mrf.mxu0 }
 0x6f8   :  { %v1132_v26 = vrot.slane %v1014_v19, 4  ;;  %v1042_v27 = vpop.f32.mrf.mxu1 }
 0x6f9   :  { %v1135_v33 = vrot.slane %v1042_v27, 3  ;;  %v1606_v46 = vpop.eup %1605 }
 0x6fa   :  { %v1168_v50 = vadd.f32 %v1606_v46, %v1732_v36 }
 0x6fc   :  { %v1170_v52 = vmul.f32 %v1730_v35, %v1168_v50 }
 0x6fd   :  { %v986_v9 = vpop.f32.mrf.mxu3 }
 0x6fe   :  { %v1129_v14 = vrot.slane %v986_v9, 5 }
 0x700   :  { %v1157_v22 = vsel %vm1146_vm3, %v1156_v20, %v1129_v14 }
 0x701   :  { %v1158_v29 = vsel %vm195_vm7, %v1157_v22, %v1132_v26  ;;  %v1268_v22 = vld [vmem:[#allocation5 + $0x8b8] sm:$0xf] }
 0x702   :  { %v1159_v34 = vsel %vm1149_vm4, %v1158_v29, %v1135_v33 }
 0x703   :  { %v1160_v43 = vsel %vm1151_vm5, %v1159_v34, %v1138_v38 }
 0x70d   :  { %v1098_v39 = vpop.f32.mrf.mxu3 }
 0x70e   :  { %v1141_v40 = vrot.slane %v1098_v39, 1 }
 0x710   :  { %v1161_v44 = vsel %vm1153_vm6, %v1160_v43, %v1141_v40  ;;  %v1427_v43 = vld [vmem:[#allocation5 + $0x8b0] sm:$0x3] }
 0x711   :  { %v1165_v45 = vadd.f32 %v1163_v41, %v1161_v44  ;;  %v1426_v41 = vld [vmem:[#allocation5 + $0x8a8] sm:$0x3] }
 0x713   :  { %1607 = vtanh.f32 %v1165_v45 }
 0x719   :  { %v1608_v47 = vpop.eup %1607 }
 0x71a   :  { %v1169_v48 = vadd.f32 %v1608_v47, %v1732_v36 }
 0x71c   :  { %v1171_v51 = vmul.f32 %v1730_v35, %v1169_v48  ;;  %v1319_v35 = vld [vmem:[#allocation5 + $0x8c8] sm:$0xf] }
 0x71e   :  { %1192 = vmatpush.msrb.mxu0 %v1171_v51  ;;  %1217 = vmatpush.msrb.mxu1 %v1171_v51 }
 0x720   :  { %1193 = vmatpush.msrb.mxu0 %v1170_v52  ;;  %1218 = vmatpush.msrb.mxu1 %v1170_v52 }
 0x721   :  { %1561 = vmatmul.msk.f32.vlgmr.msrb.gmra.mxu0 %vm1174_vm1, %v1173_v53  ;;  %1562 = vmatmul.msk.f32.vlgmr.msrb.gmra.mxu1 %vm1174_vm1, %v1172_v54 }
 0x79e   :  { %v1195_v55 = vpop.f32.mrf.mxu0  ;;  %v1220_v56 = vpop.f32.mrf.mxu1 }
 0x79f   :  { %1198 = vrot.lane.b32.xlu1 %v1195_v55, %s1672_s27 }
 0x811   :  { %v1199_v36 = vpop.permute.xlu1 %1198 }
 0x812   :  { %v1221_v57 = vadd.f32 %v1220_v56, %v1199_v36 }
 0x814   :  { %v1229_v59 = vadd.f32 %v1227_v58, %v1221_v57 }
 0x816   :  { %v1232_v60 = vmul.f32 %v1718_v61, %v1229_v59 }
 0x818   :  { %1233 = vadd.xlane.f32.xlu1 %v1232_v60 }
 0x831   :  { %1322 = vperm.xlu1 %1587, %v1319_v35   ;;  %v1367_v35 = vld [vmem:[#allocation5 + $0x898] sm:$0x3] }
 0x839   :  { %1360 = vperm.xlu1 %1587, %v1327_v62   ;;  %v1366_v62 = vld [vmem:[#allocation5 + $0x890] sm:$0x3] }
 0x841   :  { %1422 = vperm.xlu1 %1587, %v1419_v63   ;;  %v1496_v63 = vld [vmem:[#allocation5 + $0x980] sm:$0xff] }
 0x88b   :  { %v1234_v0 = vpop.xlane.xlu1 %1233 }
 0x88c   :  { %v1235_v1 = vmul.f32 0.01724138, %v1234_v0  ;;  %v1495_v0 = vld [vmem:[#allocation5 + $0x978] sm:$0xff] }
 0x88e   :  { %v1236_v2 = vsub.f32 %v1229_v59, %v1235_v1  ;;  %v1494_v1 = vld [vmem:[#allocation5 + $0x970] sm:$0xff] }
 0x890   :  { %v1237_v3 = vmul.f32 %v1718_v61, %v1236_v2 }
 0x892   :  { %v1238_v4 = vmul.f32 %v1237_v3, %v1237_v3  ;;  %v1492_v3 = vld [vmem:[#allocation5 + $0x960] sm:$0xff] }
 0x894   :  { %1239 = vadd.xlane.f32.xlu0 %v1238_v4  ;;  %v1490_v4 = vld [vmem:[#allocation5 + $0x950] sm:$0xff] }
 0x8a3   :  { %v1323_v29 = vpop.permute.xlu1 %1322 }
 0x8ab   :  { %v1361_v57 = vpop.permute.xlu1 %1360 }
 0x907   :  { %v1240_v5 = vpop.xlane.xlu0 %1239 }
 0x908   :  { %v1241_v6 = vmul.f32 0.01724138, %v1240_v5 }
 0x90a   :  { %v1242_v7 = vadd.f32 1e-05, %v1241_v6  ;;  %v1489_v6 = vld [vmem:[#allocation5 + $0x948] sm:$0xff] }
 0x90c   :  { %1609 = vrsqrt.f32 %v1242_v7  ;;  %vm1249_vm9 = vweird.f32 %v1242_v7 }
 0x912   :  { %v1610_v8 = vpop.eup %1609 }
 0x913   :  { %v1244_v49 = vmul.f32 %v1610_v8, %v1242_v7  ;;  %vm1250_vm8 = vweird.f32 %v1610_v8  ;;  %v1488_v7 = vld [vmem:[#allocation5 + $0x940] sm:$0xff] }
 0x914   :  { %vm1251_vm10 = vmor %vm1249_vm9, %vm1250_vm8 }
 0x915   :  { %v1245_v9 = vmul.f32 %v1610_v8, %v1244_v49  ;;  %v1486_v49 = vld [vmem:[#allocation5 + $0x930] sm:$0xff] }
 0x917   :  { %v1246_v11 = vmul.f32 0.5, %v1245_v9  ;;  %v1485_v9 = vld [vmem:[#allocation5 + $0x928] sm:$0xff] }
 0x919   :  { %v1247_v12 = vsub.f32 1.5, %v1246_v11  ;;  %v1483_v11 = vld [vmem:[#allocation5 + $0x918] sm:$0xff] }
 0x91b   :  { %v1248_v13 = vmul.f32 %v1610_v8, %v1247_v12  ;;  %v1482_v12 = vld [vmem:[#allocation5 + $0x910] sm:$0xff] }
 0x91d   :  { %v1252_v14 = vsel %vm1251_vm10, %v1610_v8, %v1248_v13  ;;  %v1487_v8 = vld [vmem:[#allocation5 + $0x938] sm:$0xff]  ;;  %v1481_v13 = vld [vmem:[#allocation5 + $0x908] sm:$0xff] }
 0x91e   :  { %v1253_v15 = vmul.f32 %v1252_v14, %v1236_v2  ;;  %v1493_v2 = vld [vmem:[#allocation5 + $0x968] sm:$0xff] }
 0x920   :  { %v1259_v16 = vmul.f32 %v1257_v10, %v1253_v15  ;;  %v1484_v10 = vld [vmem:[#allocation5 + $0x920] sm:$0xff] }
 0x922   :  { %v1265_v19 = vadd.f32 %v1263_v17, %v1259_v16  ;;  %v1423_v17 = vpop.permute.xlu1 %1422 }
 0x924   :  { %1611 = vtanh.f32 %v1265_v19  ;;  %v1475_v19 = vstv %s1572_s30 }
 0x92a   :  { %v1612_v20 = vpop.eup %1611 }
 0x92b   :  { %v1267_v21 = vmul.f32 %v1612_v20, %v1718_v61  ;;  %v1326_v61 = vld [vmem:[#allocation5 + $0x8d0] sm:$0xf] }
 0x92d   :  { %1289 = vmatpush.msra.mxu2 %v1267_v21  ;;  %1314 = vmatpush.msra.mxu3 %v1267_v21 }
 0x92e   :  { %1563 = vmatmul.msk.f32.vlgmr.msra.gmra.mxu2 %vm1270_vm12, %v1269_v42  ;;  %1564 = vmatmul.msk.f32.vlgmr.msra.gmra.mxu3 %vm1270_vm12, %v1268_v22  ;;  %v1478_v42 = vstv %s1573_s4 }
 0x92f   :  { %1501 = vmatpush.msrb.mxu2 %v1496_v63 }
 0x931   :  { %1502 = vmatpush.msrb.mxu2 %v1495_v0 }
 0x933   :  { %1503 = vmatpush.msrb.mxu2 %v1494_v1 }
 0x935   :  { %1504 = vmatpush.msrb.mxu2 %v1493_v2 }
 0x937   :  { %1505 = vmatpush.msrb.mxu2 %v1492_v3 }
 0x9b1   :  { %v1291_v23 = vpop.f32.mrf.mxu2  ;;  %v1316_v26 = vpop.f32.mrf.mxu3 }
 0x9b2   :  { %1294 = vrot.lane.b32.xlu2 %v1291_v23, %s1673_s28 }
 0xa0c   :  { %v1295_v27 = vpop.permute.xlu2 %1294 }
 0xa0d   :  { %v1317_v28 = vadd.f32 %v1316_v26, %v1295_v27 }
 0xa0f   :  { %v1325_v30 = vadd.f32 %v1323_v29, %v1317_v28 }
 0xa11   :  { %v1328_v31 = vmul.f32 %v1708_v25, %v1325_v30 }
 0xa13   :  { %v1329_v32 = vsel %vm195_vm7, %v1328_v31, 0.0 }
 0xa14   :  { %1330 = vadd.xlane.f32.xlu0 %v1329_v32 }
 0xa28   :  { %1354 = vperm.xlu0 %1586, %v1326_v61  }
 0xa87   :  { %v1331_v33 = vpop.xlane.xlu0 %1330 }
 0xa88   :  { %v1332_v34 = vmul.f32 0.016129032, %v1331_v33 }
 0xa8a   :  { %v1333_v37 = vsub.f32 %v1325_v30, %v1332_v34 }
 0xa8c   :  { %v1334_v38 = vmul.f32 %v1708_v25, %v1333_v37 }
 0xa8e   :  { %v1335_v39 = vmul.f32 %v1334_v38, %v1334_v38 }
 0xa90   :  { %v1336_v40 = vsel %vm195_vm7, %v1335_v39, 0.0 }
 0xa91   :  { %1337 = vadd.xlane.f32.xlu2 %v1336_v40 }
 0xa9a   :  { %v1355_v56 = vpop.permute.xlu0 %1354 }
 0xaa9   :  { %1457 = vperm.xlu2 %1588, %v1426_v41  }
 0xab1   :  { %1463 = vperm.xlu2 %1588, %v1427_v43  }
 0xb04   :  { %v1338_v44 = vpop.xlane.xlu2 %1337 }
 0xb05   :  { %v1339_v45 = vmul.f32 0.016129032, %v1338_v44 }
 0xb07   :  { %v1340_v46 = vadd.f32 1e-05, %v1339_v45 }
 0xb09   :  { %1613 = vrsqrt.f32 %v1340_v46  ;;  %vm1347_vm14 = vweird.f32 %v1340_v46 }
 0xb0c   :  { %v1458_v41 = vpop.permute.xlu2 %1457 }
 0xb0f   :  { %v1614_v47 = vpop.eup %1613 }
 0xb10   :  { %v1342_v48 = vmul.f32 %v1614_v47, %v1340_v46  ;;  %vm1348_vm13 = vweird.f32 %v1614_v47 }
 0xb11   :  { %vm1349_vm15 = vmor %vm1347_vm14, %vm1348_vm13 }
 0xb12   :  { %v1343_v50 = vmul.f32 %v1614_v47, %v1342_v48 }
 0xb14   :  { %v1344_v51 = vmul.f32 0.5, %v1343_v50  ;;  %v1464_v50 = vpop.permute.xlu2 %1463 }
 0xb16   :  { %v1345_v52 = vsub.f32 1.5, %v1344_v51 }
 0xb18   :  { %v1346_v53 = vmul.f32 %v1614_v47, %v1345_v52  ;;  %v1497_v52 = vld [vmem:[#allocation5 + $0x988] sm:$0x1] }
 0xb1a   :  { %v1350_v54 = vsel %vm1349_vm15, %v1614_v47, %v1346_v53 }
 0xb1b   :  { %v1351_v55 = vmul.f32 %v1350_v54, %v1333_v37 }
 0xb1d   :  { %v1357_v36 = vmul.f32 %v1355_v56, %v1351_v55  ;;  %v1469_v55 = vstv %s1570_s5 }
 0xb1f   :  { %v1363_v58 = vadd.f32 %v1361_v57, %v1357_v36  ;;  %v1472_v57 = vstv %s1571_s6 }
 0xb21   :  { %1615 = vtanh.f32 %v1363_v58 }
 0xb27   :  { %v1616_v59 = vpop.eup %1615 }
 0xb28   :  { %v1365_v60 = vmul.f32 %v1616_v59, %v1708_v25  ;;  %v1491_v25 = vld [vmem:[#allocation5 + $0x958] sm:$0xff] }
 0xb29   :  { %1506 = vmatpush.msrb.mxu2 %v1491_v25 }
 0xb2a   :  { %1565 = vmatpush.msk.msra.mxu0 %vm195_vm7, %v1365_v60  ;;  %1567 = vmatpush.msk.msra.mxu1 %vm195_vm7, %v1365_v60  ;;  %vm1428_vm7 = vcmp.lt.s32.totalorder %v1704_v18, 32 }
 0xb2b   :  { %1566 = vmatmul.msk.f32.vlgmr.msra.gmra.mxu0 %vm236_vm11, %v1367_v35  ;;  %1568 = vmatmul.msk.f32.vlgmr.msra.gmra.mxu1 %vm236_vm11, %v1366_v62  ;;  %v1569_v20 = vsel %vm1428_vm7, 1.0, %v1669_v24 }
 0xb2c   :  { %1507 = vmatpush.msrb.mxu2 %v1490_v4 }
 0xb2e   :  { %1508 = vmatpush.msrb.mxu2 %v1489_v6 }
 0xb30   :  { %1509 = vmatpush.msrb.mxu2 %v1488_v7 }
 0xb32   :  { %1510 = vmatpush.msrb.mxu2 %v1487_v8 }
 0xb34   :  { %1511 = vmatpush.msrb.mxu2 %v1486_v49 }
 0xb36   :  { %1512 = vmatpush.msrb.mxu2 %v1485_v9 }
 0xb38   :  { %1513 = vmatpush.msrb.mxu2 %v1484_v10 }
 0xb3a   :  { %1514 = vmatpush.msrb.mxu2 %v1483_v11 }
 0xb3c   :  { %1515 = vmatpush.msrb.mxu2 %v1482_v12 }
 0xb3e   :  { %1516 = vmatpush.msrb.mxu2 %v1481_v13 }
 0xba8   :  { %v1391_v5 = vpop.f32.mrf.mxu0  ;;  %v1416_v14 = vpop.f32.mrf.mxu1 }
 0xba9   :  { %1394 = vrot.lane.b32.xlu0 %v1391_v5, %s1674_s29 }
 0xc1b   :  { %v1395_v15 = vpop.permute.xlu0 %1394 }
 0xc1c   :  { %v1417_v16 = vadd.f32 %v1416_v14, %v1395_v15 }
 0xc1e   :  { %v1425_v21 = vadd.f32 %v1423_v17, %v1417_v16 }
 0xc20   :  { %v1476_v22 = vmul.f32 %v1475_v19, %v1425_v21  ;;  %v1431_v23 = vmul.f32 %v1569_v20, %v1425_v21 }
 0xc22   :  { %v1479_v26 = vadd.f32 %v1478_v42, %v1476_v22  ;;  %v1432_v27 = vsel %vm1143_vm2, %v1431_v23, 0.0 }
 0xc23   :  { %1433 = vadd.xlane.f32.xlu0 %v1432_v27 }
 0xc24   :  { %1617 = vtanh.f32 %v1479_v26 }
 0xc2a   :  { %v1618_v28 = vpop.eup %1617 }
 0xc2b   :  { %v1499_v29 = vrot.slane %v1618_v28, 1 }
 0xc2d   :  { %1517 = vmatmul.f32.vlgmr.msrb.gmra.mxu2 %v1499_v29 }
 0xc96   :  { %v1434_v30 = vpop.xlane.xlu0 %1433 }
 0xc97   :  { %v1435_v18 = vmul.f32 0.015625, %v1434_v30 }
 0xc99   :  { %v1436_v31 = vsub.f32 %v1425_v21, %v1435_v18 }
 0xc9b   :  { %v1437_v32 = vmul.f32 %v1569_v20, %v1436_v31 }
 0xc9d   :  { %v1438_v61 = vmul.f32 %v1437_v32, %v1437_v32 }
 0xc9f   :  { %v1439_v33 = vsel %vm1143_vm2, %v1438_v61, 0.0 }
 0xca0   :  { %1440 = vadd.xlane.f32.xlu1 %v1439_v33 }
 0xcb0   :  { %v1518_v53 = vpop.f32.mrf.mxu2 }
 0xcb1   :  { %v1519_v54 = vadd.f32 %v1518_v53, %v1497_v52 }
 0xcb3   :  { %v1521_v36 = vsel %vm1174_vm1, %v1519_v54, 0.0 }
 0xcb4   :  { %v1523_v59 = vrot.slane %v1521_v36, 7 }
 0xd13   :  { %v1441_v24 = vpop.xlane.xlu1 %1440 }
 0xd14   :  { %v1442_v34 = vmul.f32 0.015625, %v1441_v24 }
 0xd16   :  { %v1443_v37 = vadd.f32 1e-05, %v1442_v34 }
 0xd18   :  { %1619 = vrsqrt.f32 %v1443_v37  ;;  %vm1450_vm0 = vweird.f32 %v1443_v37 }
 0xd1e   :  { %v1620_v38 = vpop.eup %1619 }
 0xd1f   :  { %v1445_v39 = vmul.f32 %v1620_v38, %v1443_v37  ;;  %vm1451_vm11 = vweird.f32 %v1620_v38 }
 0xd20   :  { %vm1452_vm3 = vmor %vm1450_vm0, %vm1451_vm11 }
 0xd21   :  { %v1446_v40 = vmul.f32 %v1620_v38, %v1445_v39 }
 0xd23   :  { %v1447_v43 = vmul.f32 0.5, %v1446_v40 }
 0xd25   :  { %v1448_v44 = vsub.f32 1.5, %v1447_v43 }
 0xd27   :  { %v1449_v45 = vmul.f32 %v1620_v38, %v1448_v44 }
 0xd29   :  { %v1453_v46 = vsel %vm1452_vm3, %v1620_v38, %v1449_v45 }
 0xd2a   :  { %v1454_v47 = vmul.f32 %v1453_v46, %v1436_v31 }
 0xd2c   :  { %v1460_v48 = vmul.f32 %v1458_v41, %v1454_v47 }
 0xd2e   :  { %v1466_v51 = vadd.f32 %v1464_v50, %v1460_v48 }
 0xd30   :  { %1621 = vtanh.f32 %v1466_v51 }
 0xd36   :  { %v1622_v56 = vpop.eup %1621 }
 0xd37   :  { %v1470_v58 = vmul.f32 %v1622_v56, %v1469_v55 }
 0xd39   :  { %v1473_v60 = vadd.f32 %v1472_v57, %v1470_v58 }
 0xd3b   :  { %v1525_v35 = vsel %vm1143_vm2, %v1473_v60, %v1523_v59 }
 0xd3c   :  { %1526 = vst [vmem:[%s1820_s3] sm:$0x3] %v1525_v35 }
 0xd3d   :  { %1531 = vsyncpa [#allocation3], 1 }
 0xd3e   :  { %1532 = vsyncpa [#allocation4], 1 }

</bundles_post_ra>
